<compile_context>
chip_gen: v5e
topology: v5e:2x2
jax: 0.10.0
libtpu: 0.0.40
codegen_flags: <defaults>
</compile_context>

<pallas_src>
import functools

import jax
import jax.numpy as jnp
from jax.experimental import pallas as pl
from jax.experimental.pallas import tpu as pltpu


def _msi_kernel(steps,
                x_ref, labels_ref,
                w1_ref, b1_ref,
                wih_ref, bg_ref,
                whw2_ref, b2_ref,
                embih_ref,
                pred_ref, loss_ref):
    B, E = x_ref.shape
    O = labels_ref.shape[1]
    G = 4 * E

    # ---- fc1 (once) ----
    xt = jnp.dot(x_ref[...], w1_ref[...],
                 preferred_element_type=jnp.float32) + b1_ref[...]

    # ---- loop invariants, hoisted (broadcasts emitted exactly once) ----
    bg = jnp.broadcast_to(bg_ref[...], (B, G))          # b_ih + b_hh  (B, 4E)
    b2 = jnp.broadcast_to(b2_ref[...], (B, O))          # fc2 bias     (B, O)
    w_hw2 = whw2_ref[...]                                # [W_hh | W_fc2] (E, 4E+O)
    emb_ih = embih_ref[...]                              # Emb @ W_ih     (O, 4E)
    col = jax.lax.broadcasted_iota(jnp.int32, (B, O), 1)

    # Step-0 gate pre-activation: input = dropout(fc1(x)) == fc1(x) (eval);
    # h_{-1} = 0 so the W_hh term vanishes (both biases still apply, as in torch).
    gpre0 = jnp.dot(xt, wih_ref[...],
                    preferred_element_type=jnp.float32) + bg

    def step(_, carry):
        gpre, c, lab, pred, loss = carry

        # ---- LSTMCell, gates packed (i|f|g|o) along the 4E lanes ----
        s = jax.nn.sigmoid(gpre)            # one EUP pass covers i, f, o
        t = jnp.tanh(gpre)                  # one EUP pass covers g
        i_g = s[:, 0 * E:1 * E]
        f_g = s[:, 1 * E:2 * E]
        g_g = t[:, 2 * E:3 * E]
        o_g = s[:, 3 * E:4 * E]
        c_new = f_g * c + i_g * g_g
        h_new = o_g * jnp.tanh(c_new)

        # ---- fused h @ [W_hh | W_fc2]: one MXU pass, vreg-aligned slices ----
        hf = jnp.dot(h_new, w_hw2, preferred_element_type=jnp.float32)
        h_whh = hf[:, :G]                   # lanes [0, 4E)    -> next-step gates
        logits = hf[:, G:] + b2             # lanes [4E, 4E+O) -> fc2 logits

        # ---- argmax (first max wins) -> one-hot ----
        m = jnp.max(logits, axis=1, keepdims=True)
        first = jnp.min(jnp.where(logits == m, col, O), axis=1, keepdims=True)
        onehot = (col == first).astype(jnp.float32)

        # ---- embedding lookup folded into W_ih: onehot @ (Emb @ W_ih) ----
        gpre_next = (jnp.dot(onehot, emb_ih,
                             preferred_element_type=jnp.float32) + h_whh + bg)

        # ---- set bookkeeping + masked NLL (mask = labels AFTER update) ----
        pred_new = jnp.maximum(pred, onehot)             # logical_or
        lab_new = lab * (1.0 - onehot)                   # and(not onehot)
        lse = jnp.log(jnp.sum(jnp.exp(logits - m), axis=1, keepdims=True)) + m
        loss_new = loss + (lse - logits) * lab_new       # -log_softmax * mask

        return (gpre_next, c_new, lab_new, pred_new, loss_new)

    init = (gpre0,
            jnp.zeros((B, E), jnp.float32),
            labels_ref[...],
            jnp.zeros((B, O), jnp.float32),
            jnp.zeros((B, O), jnp.float32))
    _, _, _, pred, loss = jax.lax.fori_loop(0, steps, step, init, unroll=True)

    # Single writeback: (B, O) prediction + scalar loss (== mean(loss/steps)).
    pred_ref[...] = pred
    loss_ref[0, 0] = jnp.sum(loss) * (1.0 / float(B * O * steps))


def multi_set_inversion_forward(inputs, labels_bool, params, steps):
    """Returns (prediction: bool (B, O), final_loss: f32 scalar)."""
    B, E = inputs.shape
    O = labels_bool.shape[1]
    f32 = jnp.float32

    # Host-side parameter folding (done once, outside the recurrent kernel).
    bg = (params["b_ih"] + params["b_hh"]).astype(f32)                  # (1, 4E)
    w_hw2 = jnp.concatenate([params["w_hh"], params["w2"]], axis=1).astype(f32)
    emb_ih = jnp.dot(params["emb"], params["w_ih"]).astype(f32)         # (O, 4E)

    args = (inputs.astype(f32), labels_bool.astype(f32),
            params["w1"].astype(f32), params["b1"].astype(f32),
            params["w_ih"].astype(f32), bg,
            w_hw2, params["b2"].astype(f32),
            emb_ih)

    vmem = pltpu.MemorySpace.VMEM
    in_specs = [pl.BlockSpec(memory_space=vmem) for _ in args]
    out_specs = (pl.BlockSpec(memory_space=vmem),
                 pl.BlockSpec(memory_space=pltpu.MemorySpace.SMEM))

    flops = int(
        2 * B * E * E                                   # fc1
        + 2 * B * E * 4 * E                             # initial gate preact
        + steps * (2 * B * E * (4 * E + O)              # fused h @ [W_hh|W_fc2]
                   + 2 * B * O * 4 * E))                # onehot @ (Emb @ W_ih)
    transcendentals = int(steps * B * (2 * 4 * E + E + O + 1))
    bytes_accessed = int(4 * (sum(a.size for a in args) + B * O + 1))

    pred_f, loss = pl.pallas_call(
        functools.partial(_msi_kernel, steps),
        out_shape=(jax.ShapeDtypeStruct((B, O), f32),
                   jax.ShapeDtypeStruct((1, 1), f32)),
        in_specs=in_specs,
        out_specs=out_specs,
        cost_estimate=pl.CostEstimate(flops=flops,
                                      transcendentals=transcendentals,
                                      bytes_accessed=bytes_accessed),
    )(*args)

    return pred_f.astype(bool), loss[0, 0]


def init_params(key, emb_dim, output_size):
    """Deterministic parameter init mirroring the PyTorch module's shapes."""
    ks = jax.random.split(key, 9)
    lim_e = 1.0 / jnp.sqrt(emb_dim)
    u = lambda k, shape, lim: jax.random.uniform(k, shape, jnp.float32, -lim, lim)
    return {
        # fc1: Linear(E, E)  -> stored as (in, out)
        "w1": u(ks[0], (emb_dim, emb_dim), lim_e),
        "b1": u(ks[1], (1, emb_dim), lim_e),
        # LSTMCell(E, E): weight_ih/hh are (4E, E) in torch; stored transposed
        "w_ih": u(ks[2], (emb_dim, 4 * emb_dim), lim_e),
        "b_ih": u(ks[3], (1, 4 * emb_dim), lim_e),
        "w_hh": u(ks[4], (emb_dim, 4 * emb_dim), lim_e),
        "b_hh": u(ks[5], (1, 4 * emb_dim), lim_e),
        # fc2: Linear(E, output_size) -> (in, out)
        "w2": u(ks[6], (emb_dim, output_size), lim_e),
        "b2": u(ks[7], (1, output_size), lim_e),
        # Embedding(output_size, E): N(0, 1)
        "emb": jax.random.normal(ks[8], (output_size, emb_dim), jnp.float32),
    }


if __name__ == "__main__":
    B, EMB_DIM, OUTPUT_SIZE, STEPS = 4, 32, 16, 8

    key = jax.random.PRNGKey(0)
    k_in, k_lab, k_par = jax.random.split(key, 3)

    inputs = jax.random.normal(k_in, (B, EMB_DIM), jnp.float32)
    labels = jax.random.bernoulli(k_lab, 0.3, (B, OUTPUT_SIZE))  # bool multi-hot
    params = init_params(k_par, EMB_DIM, OUTPUT_SIZE)

    prediction, final_loss = multi_set_inversion_forward(inputs, labels,
                                                         params, STEPS)
    jax.block_until_ready((prediction, final_loss))

    assert prediction.shape == (B, OUTPUT_SIZE) and prediction.dtype == jnp.bool_
    assert final_loss.shape == ()
    print("KERNEL_OK")
</pallas_src>

<mosaic_0001>
module attributes {stable_mosaic.version = 11 : i64} {
  func.func @_msi_kernel(%arg0: memref<4x32xf32, #tpu.memory_space<vmem>>, %arg1: memref<4x16xf32, #tpu.memory_space<vmem>>, %arg2: memref<32x32xf32, #tpu.memory_space<vmem>>, %arg3: memref<1x32xf32, #tpu.memory_space<vmem>>, %arg4: memref<32x128xf32, #tpu.memory_space<vmem>>, %arg5: memref<1x128xf32, #tpu.memory_space<vmem>>, %arg6: memref<32x144xf32, #tpu.memory_space<vmem>>, %arg7: memref<1x16xf32, #tpu.memory_space<vmem>>, %arg8: memref<16x128xf32, #tpu.memory_space<vmem>>, %arg9: memref<4x16xf32, #tpu.memory_space<vmem>>, %arg10: memref<1x1xf32, #tpu.memory_space<smem>>) attributes {dimension_semantics = [], scalar_prefetch = 0 : i64, scratch_operands = 0 : i64, tpu.core_type = #tpu.core_type<tc>} {
    %c0 = arith.constant 0 : index
    %c0_0 = arith.constant 0 : index
    %0 = vector.load %arg0[%c0, %c0_0] : memref<4x32xf32, #tpu.memory_space<vmem>>, vector<4x32xf32>
    %c0_1 = arith.constant 0 : index
    %c0_2 = arith.constant 0 : index
    %1 = vector.load %arg2[%c0_1, %c0_2] : memref<32x32xf32, #tpu.memory_space<vmem>>, vector<32x32xf32>
    %cst = arith.constant dense<0.000000e+00> : vector<4x32xf32>
    %2 = tpu.matmul %0, %1, %cst {dimension_numbers = #tpu.dot_dimension_numbers<[1], [0], [0], [1], [0, 0, 1, 1], [], []>} : vector<4x32xf32>, vector<32x32xf32>, vector<4x32xf32> -> vector<4x32xf32>
    %c0_3 = arith.constant 0 : index
    %c0_4 = arith.constant 0 : index
    %3 = vector.load %arg3[%c0_3, %c0_4] : memref<1x32xf32, #tpu.memory_space<vmem>>, vector<1x32xf32>
    %4 = vector.broadcast %3 : vector<1x32xf32> to vector<4x32xf32>
    %5 = arith.addf %2, %4 : vector<4x32xf32>
    %c0_5 = arith.constant 0 : index
    %c0_6 = arith.constant 0 : index
    %6 = vector.load %arg5[%c0_5, %c0_6] : memref<1x128xf32, #tpu.memory_space<vmem>>, vector<1x128xf32>
    %7 = vector.shape_cast %6 : vector<1x128xf32> to vector<1x128xf32>
    %8 = vector.broadcast %7 : vector<1x128xf32> to vector<4x128xf32>
    %c0_7 = arith.constant 0 : index
    %c0_8 = arith.constant 0 : index
    %9 = vector.load %arg7[%c0_7, %c0_8] : memref<1x16xf32, #tpu.memory_space<vmem>>, vector<1x16xf32>
    %10 = vector.shape_cast %9 : vector<1x16xf32> to vector<1x16xf32>
    %11 = vector.broadcast %10 : vector<1x16xf32> to vector<4x16xf32>
    %c0_9 = arith.constant 0 : index
    %c0_10 = arith.constant 0 : index
    %12 = vector.load %arg6[%c0_9, %c0_10] : memref<32x144xf32, #tpu.memory_space<vmem>>, vector<32x144xf32>
    %c0_11 = arith.constant 0 : index
    %c0_12 = arith.constant 0 : index
    %13 = vector.load %arg8[%c0_11, %c0_12] : memref<16x128xf32, #tpu.memory_space<vmem>>, vector<16x128xf32>
    %14 = tpu.iota {dimensions = array<i32: 1>} : vector<4x16xi32>
    %c0_13 = arith.constant 0 : index
    %c0_14 = arith.constant 0 : index
    %15 = vector.load %arg4[%c0_13, %c0_14] : memref<32x128xf32, #tpu.memory_space<vmem>>, vector<32x128xf32>
    %cst_15 = arith.constant dense<0.000000e+00> : vector<4x128xf32>
    %16 = tpu.matmul %5, %15, %cst_15 {dimension_numbers = #tpu.dot_dimension_numbers<[1], [0], [0], [1], [0, 0, 1, 1], [], []>} : vector<4x32xf32>, vector<32x128xf32>, vector<4x128xf32> -> vector<4x128xf32>
    %17 = arith.addf %16, %8 : vector<4x128xf32>
    %cst_16 = arith.constant 0.000000e+00 : f32
    %18 = vector.broadcast %cst_16 : f32 to vector<4x32xf32>
    %c0_17 = arith.constant 0 : index
    %c0_18 = arith.constant 0 : index
    %19 = vector.load %arg1[%c0_17, %c0_18] : memref<4x16xf32, #tpu.memory_space<vmem>>, vector<4x16xf32>
    %cst_19 = arith.constant 0.000000e+00 : f32
    %20 = vector.broadcast %cst_19 : f32 to vector<4x16xf32>
    %cst_20 = arith.constant 0.000000e+00 : f32
    %21 = vector.broadcast %cst_20 : f32 to vector<4x16xf32>
    %c0_i32 = arith.constant 0 : i32
    %22 = arith.negf %17 : vector<4x128xf32>
    %23 = math.exp %22 : vector<4x128xf32>
    %cst_21 = arith.constant 1.000000e+00 : f32
    %24 = vector.broadcast %cst_21 : f32 to vector<4x128xf32>
    %25 = arith.addf %24, %23 : vector<4x128xf32>
    %26 = arith.divf %24, %25 : vector<4x128xf32>
    %27 = math.tanh %17 : vector<4x128xf32>
    %28 = vector.extract_strided_slice %26 {offsets = [0, 0], sizes = [4, 32], strides = [1, 1]} : vector<4x128xf32> to vector<4x32xf32>
    %29 = vector.extract_strided_slice %26 {offsets = [0, 32], sizes = [4, 32], strides = [1, 1]} : vector<4x128xf32> to vector<4x32xf32>
    %30 = vector.extract_strided_slice %27 {offsets = [0, 64], sizes = [4, 32], strides = [1, 1]} : vector<4x128xf32> to vector<4x32xf32>
    %31 = vector.extract_strided_slice %26 {offsets = [0, 96], sizes = [4, 32], strides = [1, 1]} : vector<4x128xf32> to vector<4x32xf32>
    %32 = arith.mulf %29, %18 : vector<4x32xf32>
    %33 = arith.mulf %28, %30 : vector<4x32xf32>
    %34 = arith.addf %32, %33 : vector<4x32xf32>
    %35 = math.tanh %34 : vector<4x32xf32>
    %36 = arith.mulf %31, %35 : vector<4x32xf32>
    %cst_22 = arith.constant dense<0.000000e+00> : vector<4x144xf32>
    %37 = tpu.matmul %36, %12, %cst_22 {dimension_numbers = #tpu.dot_dimension_numbers<[1], [0], [0], [1], [0, 0, 1, 1], [], []>} : vector<4x32xf32>, vector<32x144xf32>, vector<4x144xf32> -> vector<4x144xf32>
    %38 = vector.extract_strided_slice %37 {offsets = [0, 0], sizes = [4, 128], strides = [1, 1]} : vector<4x144xf32> to vector<4x128xf32>
    %39 = vector.extract_strided_slice %37 {offsets = [0, 128], sizes = [4, 16], strides = [1, 1]} : vector<4x144xf32> to vector<4x16xf32>
    %40 = arith.addf %39, %11 : vector<4x16xf32>
    %cst_23 = arith.constant dense<0xFF800000> : vector<4xf32>
    %41 = vector.multi_reduction <maximumf>, %40, %cst_23 [1] : vector<4x16xf32> to vector<4xf32>
    %42 = vector.shape_cast %41 : vector<4xf32> to vector<4x1xf32>
    %43 = vector.broadcast %42 : vector<4x1xf32> to vector<4x16xf32>
    %44 = arith.cmpf oeq, %40, %43 : vector<4x16xf32>
    %c16_i32 = arith.constant 16 : i32
    %45 = vector.broadcast %c16_i32 : i32 to vector<4x16xi32>
    %46 = arith.select %44, %14, %45 : vector<4x16xi1>, vector<4x16xi32>
    %cst_24 = arith.constant dense<2147483647> : vector<4xi32>
    %47 = vector.multi_reduction <minsi>, %46, %cst_24 [1] : vector<4x16xi32> to vector<4xi32>
    %48 = vector.shape_cast %47 : vector<4xi32> to vector<4x1xi32>
    %49 = vector.broadcast %48 : vector<4x1xi32> to vector<4x16xi32>
    %50 = arith.cmpi eq, %14, %49 : vector<4x16xi32>
    %51 = arith.extui %50 : vector<4x16xi1> to vector<4x16xi32>
    %52 = arith.sitofp %51 : vector<4x16xi32> to vector<4x16xf32>
    %cst_25 = arith.constant dense<0.000000e+00> : vector<4x128xf32>
    %53 = tpu.matmul %52, %13, %cst_25 {dimension_numbers = #tpu.dot_dimension_numbers<[1], [0], [0], [1], [0, 0, 1, 1], [], []>} : vector<4x16xf32>, vector<16x128xf32>, vector<4x128xf32> -> vector<4x128xf32>
    %54 = arith.addf %53, %38 : vector<4x128xf32>
    %55 = arith.addf %54, %8 : vector<4x128xf32>
    %56 = arith.maximumf %20, %52 : vector<4x16xf32>
    %cst_26 = arith.constant 1.000000e+00 : f32
    %57 = vector.broadcast %cst_26 : f32 to vector<4x16xf32>
    %58 = arith.subf %57, %52 : vector<4x16xf32>
    %59 = arith.mulf %19, %58 : vector<4x16xf32>
    %60 = vector.broadcast %42 : vector<4x1xf32> to vector<4x16xf32>
    %61 = arith.subf %40, %60 : vector<4x16xf32>
    %62 = math.exp %61 : vector<4x16xf32>
    %cst_27 = arith.constant dense<0.000000e+00> : vector<4xf32>
    %63 = vector.multi_reduction <add>, %62, %cst_27 [1] : vector<4x16xf32> to vector<4xf32>
    %64 = vector.shape_cast %63 : vector<4xf32> to vector<4x1xf32>
    %65 = math.log %64 : vector<4x1xf32>
    %66 = arith.addf %65, %42 : vector<4x1xf32>
    %67 = vector.broadcast %66 : vector<4x1xf32> to vector<4x16xf32>
    %68 = arith.subf %67, %40 : vector<4x16xf32>
    %69 = arith.mulf %68, %59 : vector<4x16xf32>
    %70 = arith.addf %21, %69 : vector<4x16xf32>
    %c1_i32 = arith.constant 1 : i32
    %71 = arith.negf %55 : vector<4x128xf32>
    %72 = math.exp %71 : vector<4x128xf32>
    %cst_28 = arith.constant 1.000000e+00 : f32
    %73 = vector.broadcast %cst_28 : f32 to vector<4x128xf32>
    %74 = arith.addf %73, %72 : vector<4x128xf32>
    %75 = arith.divf %73, %74 : vector<4x128xf32>
    %76 = math.tanh %55 : vector<4x128xf32>
    %77 = vector.extract_strided_slice %75 {offsets = [0, 0], sizes = [4, 32], strides = [1, 1]} : vector<4x128xf32> to vector<4x32xf32>
    %78 = vector.extract_strided_slice %75 {offsets = [0, 32], sizes = [4, 32], strides = [1, 1]} : vector<4x128xf32> to vector<4x32xf32>
    %79 = vector.extract_strided_slice %76 {offsets = [0, 64], sizes = [4, 32], strides = [1, 1]} : vector<4x128xf32> to vector<4x32xf32>
    %80 = vector.extract_strided_slice %75 {offsets = [0, 96], sizes = [4, 32], strides = [1, 1]} : vector<4x128xf32> to vector<4x32xf32>
    %81 = arith.mulf %78, %34 : vector<4x32xf32>
    %82 = arith.mulf %77, %79 : vector<4x32xf32>
    %83 = arith.addf %81, %82 : vector<4x32xf32>
    %84 = math.tanh %83 : vector<4x32xf32>
    %85 = arith.mulf %80, %84 : vector<4x32xf32>
    %cst_29 = arith.constant dense<0.000000e+00> : vector<4x144xf32>
    %86 = tpu.matmul %85, %12, %cst_29 {dimension_numbers = #tpu.dot_dimension_numbers<[1], [0], [0], [1], [0, 0, 1, 1], [], []>} : vector<4x32xf32>, vector<32x144xf32>, vector<4x144xf32> -> vector<4x144xf32>
    %87 = vector.extract_strided_slice %86 {offsets = [0, 0], sizes = [4, 128], strides = [1, 1]} : vector<4x144xf32> to vector<4x128xf32>
    %88 = vector.extract_strided_slice %86 {offsets = [0, 128], sizes = [4, 16], strides = [1, 1]} : vector<4x144xf32> to vector<4x16xf32>
    %89 = arith.addf %88, %11 : vector<4x16xf32>
    %cst_30 = arith.constant dense<0xFF800000> : vector<4xf32>
    %90 = vector.multi_reduction <maximumf>, %89, %cst_30 [1] : vector<4x16xf32> to vector<4xf32>
    %91 = vector.shape_cast %90 : vector<4xf32> to vector<4x1xf32>
    %92 = vector.broadcast %91 : vector<4x1xf32> to vector<4x16xf32>
    %93 = arith.cmpf oeq, %89, %92 : vector<4x16xf32>
    %c16_i32_31 = arith.constant 16 : i32
    %94 = vector.broadcast %c16_i32_31 : i32 to vector<4x16xi32>
    %95 = arith.select %93, %14, %94 : vector<4x16xi1>, vector<4x16xi32>
    %cst_32 = arith.constant dense<2147483647> : vector<4xi32>
    %96 = vector.multi_reduction <minsi>, %95, %cst_32 [1] : vector<4x16xi32> to vector<4xi32>
    %97 = vector.shape_cast %96 : vector<4xi32> to vector<4x1xi32>
    %98 = vector.broadcast %97 : vector<4x1xi32> to vector<4x16xi32>
    %99 = arith.cmpi eq, %14, %98 : vector<4x16xi32>
    %100 = arith.extui %99 : vector<4x16xi1> to vector<4x16xi32>
    %101 = arith.sitofp %100 : vector<4x16xi32> to vector<4x16xf32>
    %cst_33 = arith.constant dense<0.000000e+00> : vector<4x128xf32>
    %102 = tpu.matmul %101, %13, %cst_33 {dimension_numbers = #tpu.dot_dimension_numbers<[1], [0], [0], [1], [0, 0, 1, 1], [], []>} : vector<4x16xf32>, vector<16x128xf32>, vector<4x128xf32> -> vector<4x128xf32>
    %103 = arith.addf %102, %87 : vector<4x128xf32>
    %104 = arith.addf %103, %8 : vector<4x128xf32>
    %105 = arith.maximumf %56, %101 : vector<4x16xf32>
    %cst_34 = arith.constant 1.000000e+00 : f32
    %106 = vector.broadcast %cst_34 : f32 to vector<4x16xf32>
    %107 = arith.subf %106, %101 : vector<4x16xf32>
    %108 = arith.mulf %59, %107 : vector<4x16xf32>
    %109 = vector.broadcast %91 : vector<4x1xf32> to vector<4x16xf32>
    %110 = arith.subf %89, %109 : vector<4x16xf32>
    %111 = math.exp %110 : vector<4x16xf32>
    %cst_35 = arith.constant dense<0.000000e+00> : vector<4xf32>
    %112 = vector.multi_reduction <add>, %111, %cst_35 [1] : vector<4x16xf32> to vector<4xf32>
    %113 = vector.shape_cast %112 : vector<4xf32> to vector<4x1xf32>
    %114 = math.log %113 : vector<4x1xf32>
    %115 = arith.addf %114, %91 : vector<4x1xf32>
    %116 = vector.broadcast %115 : vector<4x1xf32> to vector<4x16xf32>
    %117 = arith.subf %116, %89 : vector<4x16xf32>
    %118 = arith.mulf %117, %108 : vector<4x16xf32>
    %119 = arith.addf %70, %118 : vector<4x16xf32>
    %c2_i32 = arith.constant 2 : i32
    %120 = arith.negf %104 : vector<4x128xf32>
    %121 = math.exp %120 : vector<4x128xf32>
    %cst_36 = arith.constant 1.000000e+00 : f32
    %122 = vector.broadcast %cst_36 : f32 to vector<4x128xf32>
    %123 = arith.addf %122, %121 : vector<4x128xf32>
    %124 = arith.divf %122, %123 : vector<4x128xf32>
    %125 = math.tanh %104 : vector<4x128xf32>
    %126 = vector.extract_strided_slice %124 {offsets = [0, 0], sizes = [4, 32], strides = [1, 1]} : vector<4x128xf32> to vector<4x32xf32>
    %127 = vector.extract_strided_slice %124 {offsets = [0, 32], sizes = [4, 32], strides = [1, 1]} : vector<4x128xf32> to vector<4x32xf32>
    %128 = vector.extract_strided_slice %125 {offsets = [0, 64], sizes = [4, 32], strides = [1, 1]} : vector<4x128xf32> to vector<4x32xf32>
    %129 = vector.extract_strided_slice %124 {offsets = [0, 96], sizes = [4, 32], strides = [1, 1]} : vector<4x128xf32> to vector<4x32xf32>
    %130 = arith.mulf %127, %83 : vector<4x32xf32>
    %131 = arith.mulf %126, %128 : vector<4x32xf32>
    %132 = arith.addf %130, %131 : vector<4x32xf32>
    %133 = math.tanh %132 : vector<4x32xf32>
    %134 = arith.mulf %129, %133 : vector<4x32xf32>
    %cst_37 = arith.constant dense<0.000000e+00> : vector<4x144xf32>
    %135 = tpu.matmul %134, %12, %cst_37 {dimension_numbers = #tpu.dot_dimension_numbers<[1], [0], [0], [1], [0, 0, 1, 1], [], []>} : vector<4x32xf32>, vector<32x144xf32>, vector<4x144xf32> -> vector<4x144xf32>
    %136 = vector.extract_strided_slice %135 {offsets = [0, 0], sizes = [4, 128], strides = [1, 1]} : vector<4x144xf32> to vector<4x128xf32>
    %137 = vector.extract_strided_slice %135 {offsets = [0, 128], sizes = [4, 16], strides = [1, 1]} : vector<4x144xf32> to vector<4x16xf32>
    %138 = arith.addf %137, %11 : vector<4x16xf32>
    %cst_38 = arith.constant dense<0xFF800000> : vector<4xf32>
    %139 = vector.multi_reduction <maximumf>, %138, %cst_38 [1] : vector<4x16xf32> to vector<4xf32>
    %140 = vector.shape_cast %139 : vector<4xf32> to vector<4x1xf32>
    %141 = vector.broadcast %140 : vector<4x1xf32> to vector<4x16xf32>
    %142 = arith.cmpf oeq, %138, %141 : vector<4x16xf32>
    %c16_i32_39 = arith.constant 16 : i32
    %143 = vector.broadcast %c16_i32_39 : i32 to vector<4x16xi32>
    %144 = arith.select %142, %14, %143 : vector<4x16xi1>, vector<4x16xi32>
    %cst_40 = arith.constant dense<2147483647> : vector<4xi32>
    %145 = vector.multi_reduction <minsi>, %144, %cst_40 [1] : vector<4x16xi32> to vector<4xi32>
    %146 = vector.shape_cast %145 : vector<4xi32> to vector<4x1xi32>
    %147 = vector.broadcast %146 : vector<4x1xi32> to vector<4x16xi32>
    %148 = arith.cmpi eq, %14, %147 : vector<4x16xi32>
    %149 = arith.extui %148 : vector<4x16xi1> to vector<4x16xi32>
    %150 = arith.sitofp %149 : vector<4x16xi32> to vector<4x16xf32>
    %cst_41 = arith.constant dense<0.000000e+00> : vector<4x128xf32>
    %151 = tpu.matmul %150, %13, %cst_41 {dimension_numbers = #tpu.dot_dimension_numbers<[1], [0], [0], [1], [0, 0, 1, 1], [], []>} : vector<4x16xf32>, vector<16x128xf32>, vector<4x128xf32> -> vector<4x128xf32>
    %152 = arith.addf %151, %136 : vector<4x128xf32>
    %153 = arith.addf %152, %8 : vector<4x128xf32>
    %154 = arith.maximumf %105, %150 : vector<4x16xf32>
    %cst_42 = arith.constant 1.000000e+00 : f32
    %155 = vector.broadcast %cst_42 : f32 to vector<4x16xf32>
    %156 = arith.subf %155, %150 : vector<4x16xf32>
    %157 = arith.mulf %108, %156 : vector<4x16xf32>
    %158 = vector.broadcast %140 : vector<4x1xf32> to vector<4x16xf32>
    %159 = arith.subf %138, %158 : vector<4x16xf32>
    %160 = math.exp %159 : vector<4x16xf32>
    %cst_43 = arith.constant dense<0.000000e+00> : vector<4xf32>
    %161 = vector.multi_reduction <add>, %160, %cst_43 [1] : vector<4x16xf32> to vector<4xf32>
    %162 = vector.shape_cast %161 : vector<4xf32> to vector<4x1xf32>
    %163 = math.log %162 : vector<4x1xf32>
    %164 = arith.addf %163, %140 : vector<4x1xf32>
    %165 = vector.broadcast %164 : vector<4x1xf32> to vector<4x16xf32>
    %166 = arith.subf %165, %138 : vector<4x16xf32>
    %167 = arith.mulf %166, %157 : vector<4x16xf32>
    %168 = arith.addf %119, %167 : vector<4x16xf32>
    %c3_i32 = arith.constant 3 : i32
    %169 = arith.negf %153 : vector<4x128xf32>
    %170 = math.exp %169 : vector<4x128xf32>
    %cst_44 = arith.constant 1.000000e+00 : f32
    %171 = vector.broadcast %cst_44 : f32 to vector<4x128xf32>
    %172 = arith.addf %171, %170 : vector<4x128xf32>
    %173 = arith.divf %171, %172 : vector<4x128xf32>
    %174 = math.tanh %153 : vector<4x128xf32>
    %175 = vector.extract_strided_slice %173 {offsets = [0, 0], sizes = [4, 32], strides = [1, 1]} : vector<4x128xf32> to vector<4x32xf32>
    %176 = vector.extract_strided_slice %173 {offsets = [0, 32], sizes = [4, 32], strides = [1, 1]} : vector<4x128xf32> to vector<4x32xf32>
    %177 = vector.extract_strided_slice %174 {offsets = [0, 64], sizes = [4, 32], strides = [1, 1]} : vector<4x128xf32> to vector<4x32xf32>
    %178 = vector.extract_strided_slice %173 {offsets = [0, 96], sizes = [4, 32], strides = [1, 1]} : vector<4x128xf32> to vector<4x32xf32>
    %179 = arith.mulf %176, %132 : vector<4x32xf32>
    %180 = arith.mulf %175, %177 : vector<4x32xf32>
    %181 = arith.addf %179, %180 : vector<4x32xf32>
    %182 = math.tanh %181 : vector<4x32xf32>
    %183 = arith.mulf %178, %182 : vector<4x32xf32>
    %cst_45 = arith.constant dense<0.000000e+00> : vector<4x144xf32>
    %184 = tpu.matmul %183, %12, %cst_45 {dimension_numbers = #tpu.dot_dimension_numbers<[1], [0], [0], [1], [0, 0, 1, 1], [], []>} : vector<4x32xf32>, vector<32x144xf32>, vector<4x144xf32> -> vector<4x144xf32>
    %185 = vector.extract_strided_slice %184 {offsets = [0, 0], sizes = [4, 128], strides = [1, 1]} : vector<4x144xf32> to vector<4x128xf32>
    %186 = vector.extract_strided_slice %184 {offsets = [0, 128], sizes = [4, 16], strides = [1, 1]} : vector<4x144xf32> to vector<4x16xf32>
    %187 = arith.addf %186, %11 : vector<4x16xf32>
    %cst_46 = arith.constant dense<0xFF800000> : vector<4xf32>
    %188 = vector.multi_reduction <maximumf>, %187, %cst_46 [1] : vector<4x16xf32> to vector<4xf32>
    %189 = vector.shape_cast %188 : vector<4xf32> to vector<4x1xf32>
    %190 = vector.broadcast %189 : vector<4x1xf32> to vector<4x16xf32>
    %191 = arith.cmpf oeq, %187, %190 : vector<4x16xf32>
    %c16_i32_47 = arith.constant 16 : i32
    %192 = vector.broadcast %c16_i32_47 : i32 to vector<4x16xi32>
    %193 = arith.select %191, %14, %192 : vector<4x16xi1>, vector<4x16xi32>
    %cst_48 = arith.constant dense<2147483647> : vector<4xi32>
    %194 = vector.multi_reduction <minsi>, %193, %cst_48 [1] : vector<4x16xi32> to vector<4xi32>
    %195 = vector.shape_cast %194 : vector<4xi32> to vector<4x1xi32>
    %196 = vector.broadcast %195 : vector<4x1xi32> to vector<4x16xi32>
    %197 = arith.cmpi eq, %14, %196 : vector<4x16xi32>
    %198 = arith.extui %197 : vector<4x16xi1> to vector<4x16xi32>
    %199 = arith.sitofp %198 : vector<4x16xi32> to vector<4x16xf32>
    %cst_49 = arith.constant dense<0.000000e+00> : vector<4x128xf32>
    %200 = tpu.matmul %199, %13, %cst_49 {dimension_numbers = #tpu.dot_dimension_numbers<[1], [0], [0], [1], [0, 0, 1, 1], [], []>} : vector<4x16xf32>, vector<16x128xf32>, vector<4x128xf32> -> vector<4x128xf32>
    %201 = arith.addf %200, %185 : vector<4x128xf32>
    %202 = arith.addf %201, %8 : vector<4x128xf32>
    %203 = arith.maximumf %154, %199 : vector<4x16xf32>
    %cst_50 = arith.constant 1.000000e+00 : f32
    %204 = vector.broadcast %cst_50 : f32 to vector<4x16xf32>
    %205 = arith.subf %204, %199 : vector<4x16xf32>
    %206 = arith.mulf %157, %205 : vector<4x16xf32>
    %207 = vector.broadcast %189 : vector<4x1xf32> to vector<4x16xf32>
    %208 = arith.subf %187, %207 : vector<4x16xf32>
    %209 = math.exp %208 : vector<4x16xf32>
    %cst_51 = arith.constant dense<0.000000e+00> : vector<4xf32>
    %210 = vector.multi_reduction <add>, %209, %cst_51 [1] : vector<4x16xf32> to vector<4xf32>
    %211 = vector.shape_cast %210 : vector<4xf32> to vector<4x1xf32>
    %212 = math.log %211 : vector<4x1xf32>
    %213 = arith.addf %212, %189 : vector<4x1xf32>
    %214 = vector.broadcast %213 : vector<4x1xf32> to vector<4x16xf32>
    %215 = arith.subf %214, %187 : vector<4x16xf32>
    %216 = arith.mulf %215, %206 : vector<4x16xf32>
    %217 = arith.addf %168, %216 : vector<4x16xf32>
    %c4_i32 = arith.constant 4 : i32
    %218 = arith.negf %202 : vector<4x128xf32>
    %219 = math.exp %218 : vector<4x128xf32>
    %cst_52 = arith.constant 1.000000e+00 : f32
    %220 = vector.broadcast %cst_52 : f32 to vector<4x128xf32>
    %221 = arith.addf %220, %219 : vector<4x128xf32>
    %222 = arith.divf %220, %221 : vector<4x128xf32>
    %223 = math.tanh %202 : vector<4x128xf32>
    %224 = vector.extract_strided_slice %222 {offsets = [0, 0], sizes = [4, 32], strides = [1, 1]} : vector<4x128xf32> to vector<4x32xf32>
    %225 = vector.extract_strided_slice %222 {offsets = [0, 32], sizes = [4, 32], strides = [1, 1]} : vector<4x128xf32> to vector<4x32xf32>
    %226 = vector.extract_strided_slice %223 {offsets = [0, 64], sizes = [4, 32], strides = [1, 1]} : vector<4x128xf32> to vector<4x32xf32>
    %227 = vector.extract_strided_slice %222 {offsets = [0, 96], sizes = [4, 32], strides = [1, 1]} : vector<4x128xf32> to vector<4x32xf32>
    %228 = arith.mulf %225, %181 : vector<4x32xf32>
    %229 = arith.mulf %224, %226 : vector<4x32xf32>
    %230 = arith.addf %228, %229 : vector<4x32xf32>
    %231 = math.tanh %230 : vector<4x32xf32>
    %232 = arith.mulf %227, %231 : vector<4x32xf32>
    %cst_53 = arith.constant dense<0.000000e+00> : vector<4x144xf32>
    %233 = tpu.matmul %232, %12, %cst_53 {dimension_numbers = #tpu.dot_dimension_numbers<[1], [0], [0], [1], [0, 0, 1, 1], [], []>} : vector<4x32xf32>, vector<32x144xf32>, vector<4x144xf32> -> vector<4x144xf32>
    %234 = vector.extract_strided_slice %233 {offsets = [0, 0], sizes = [4, 128], strides = [1, 1]} : vector<4x144xf32> to vector<4x128xf32>
    %235 = vector.extract_strided_slice %233 {offsets = [0, 128], sizes = [4, 16], strides = [1, 1]} : vector<4x144xf32> to vector<4x16xf32>
    %236 = arith.addf %235, %11 : vector<4x16xf32>
    %cst_54 = arith.constant dense<0xFF800000> : vector<4xf32>
    %237 = vector.multi_reduction <maximumf>, %236, %cst_54 [1] : vector<4x16xf32> to vector<4xf32>
    %238 = vector.shape_cast %237 : vector<4xf32> to vector<4x1xf32>
    %239 = vector.broadcast %238 : vector<4x1xf32> to vector<4x16xf32>
    %240 = arith.cmpf oeq, %236, %239 : vector<4x16xf32>
    %c16_i32_55 = arith.constant 16 : i32
    %241 = vector.broadcast %c16_i32_55 : i32 to vector<4x16xi32>
    %242 = arith.select %240, %14, %241 : vector<4x16xi1>, vector<4x16xi32>
    %cst_56 = arith.constant dense<2147483647> : vector<4xi32>
    %243 = vector.multi_reduction <minsi>, %242, %cst_56 [1] : vector<4x16xi32> to vector<4xi32>
    %244 = vector.shape_cast %243 : vector<4xi32> to vector<4x1xi32>
    %245 = vector.broadcast %244 : vector<4x1xi32> to vector<4x16xi32>
    %246 = arith.cmpi eq, %14, %245 : vector<4x16xi32>
    %247 = arith.extui %246 : vector<4x16xi1> to vector<4x16xi32>
    %248 = arith.sitofp %247 : vector<4x16xi32> to vector<4x16xf32>
    %cst_57 = arith.constant dense<0.000000e+00> : vector<4x128xf32>
    %249 = tpu.matmul %248, %13, %cst_57 {dimension_numbers = #tpu.dot_dimension_numbers<[1], [0], [0], [1], [0, 0, 1, 1], [], []>} : vector<4x16xf32>, vector<16x128xf32>, vector<4x128xf32> -> vector<4x128xf32>
    %250 = arith.addf %249, %234 : vector<4x128xf32>
    %251 = arith.addf %250, %8 : vector<4x128xf32>
    %252 = arith.maximumf %203, %248 : vector<4x16xf32>
    %cst_58 = arith.constant 1.000000e+00 : f32
    %253 = vector.broadcast %cst_58 : f32 to vector<4x16xf32>
    %254 = arith.subf %253, %248 : vector<4x16xf32>
    %255 = arith.mulf %206, %254 : vector<4x16xf32>
    %256 = vector.broadcast %238 : vector<4x1xf32> to vector<4x16xf32>
    %257 = arith.subf %236, %256 : vector<4x16xf32>
    %258 = math.exp %257 : vector<4x16xf32>
    %cst_59 = arith.constant dense<0.000000e+00> : vector<4xf32>
    %259 = vector.multi_reduction <add>, %258, %cst_59 [1] : vector<4x16xf32> to vector<4xf32>
    %260 = vector.shape_cast %259 : vector<4xf32> to vector<4x1xf32>
    %261 = math.log %260 : vector<4x1xf32>
    %262 = arith.addf %261, %238 : vector<4x1xf32>
    %263 = vector.broadcast %262 : vector<4x1xf32> to vector<4x16xf32>
    %264 = arith.subf %263, %236 : vector<4x16xf32>
    %265 = arith.mulf %264, %255 : vector<4x16xf32>
    %266 = arith.addf %217, %265 : vector<4x16xf32>
    %c5_i32 = arith.constant 5 : i32
    %267 = arith.negf %251 : vector<4x128xf32>
    %268 = math.exp %267 : vector<4x128xf32>
    %cst_60 = arith.constant 1.000000e+00 : f32
    %269 = vector.broadcast %cst_60 : f32 to vector<4x128xf32>
    %270 = arith.addf %269, %268 : vector<4x128xf32>
    %271 = arith.divf %269, %270 : vector<4x128xf32>
    %272 = math.tanh %251 : vector<4x128xf32>
    %273 = vector.extract_strided_slice %271 {offsets = [0, 0], sizes = [4, 32], strides = [1, 1]} : vector<4x128xf32> to vector<4x32xf32>
    %274 = vector.extract_strided_slice %271 {offsets = [0, 32], sizes = [4, 32], strides = [1, 1]} : vector<4x128xf32> to vector<4x32xf32>
    %275 = vector.extract_strided_slice %272 {offsets = [0, 64], sizes = [4, 32], strides = [1, 1]} : vector<4x128xf32> to vector<4x32xf32>
    %276 = vector.extract_strided_slice %271 {offsets = [0, 96], sizes = [4, 32], strides = [1, 1]} : vector<4x128xf32> to vector<4x32xf32>
    %277 = arith.mulf %274, %230 : vector<4x32xf32>
    %278 = arith.mulf %273, %275 : vector<4x32xf32>
    %279 = arith.addf %277, %278 : vector<4x32xf32>
    %280 = math.tanh %279 : vector<4x32xf32>
    %281 = arith.mulf %276, %280 : vector<4x32xf32>
    %cst_61 = arith.constant dense<0.000000e+00> : vector<4x144xf32>
    %282 = tpu.matmul %281, %12, %cst_61 {dimension_numbers = #tpu.dot_dimension_numbers<[1], [0], [0], [1], [0, 0, 1, 1], [], []>} : vector<4x32xf32>, vector<32x144xf32>, vector<4x144xf32> -> vector<4x144xf32>
    %283 = vector.extract_strided_slice %282 {offsets = [0, 0], sizes = [4, 128], strides = [1, 1]} : vector<4x144xf32> to vector<4x128xf32>
    %284 = vector.extract_strided_slice %282 {offsets = [0, 128], sizes = [4, 16], strides = [1, 1]} : vector<4x144xf32> to vector<4x16xf32>
    %285 = arith.addf %284, %11 : vector<4x16xf32>
    %cst_62 = arith.constant dense<0xFF800000> : vector<4xf32>
    %286 = vector.multi_reduction <maximumf>, %285, %cst_62 [1] : vector<4x16xf32> to vector<4xf32>
    %287 = vector.shape_cast %286 : vector<4xf32> to vector<4x1xf32>
    %288 = vector.broadcast %287 : vector<4x1xf32> to vector<4x16xf32>
    %289 = arith.cmpf oeq, %285, %288 : vector<4x16xf32>
    %c16_i32_63 = arith.constant 16 : i32
    %290 = vector.broadcast %c16_i32_63 : i32 to vector<4x16xi32>
    %291 = arith.select %289, %14, %290 : vector<4x16xi1>, vector<4x16xi32>
    %cst_64 = arith.constant dense<2147483647> : vector<4xi32>
    %292 = vector.multi_reduction <minsi>, %291, %cst_64 [1] : vector<4x16xi32> to vector<4xi32>
    %293 = vector.shape_cast %292 : vector<4xi32> to vector<4x1xi32>
    %294 = vector.broadcast %293 : vector<4x1xi32> to vector<4x16xi32>
    %295 = arith.cmpi eq, %14, %294 : vector<4x16xi32>
    %296 = arith.extui %295 : vector<4x16xi1> to vector<4x16xi32>
    %297 = arith.sitofp %296 : vector<4x16xi32> to vector<4x16xf32>
    %cst_65 = arith.constant dense<0.000000e+00> : vector<4x128xf32>
    %298 = tpu.matmul %297, %13, %cst_65 {dimension_numbers = #tpu.dot_dimension_numbers<[1], [0], [0], [1], [0, 0, 1, 1], [], []>} : vector<4x16xf32>, vector<16x128xf32>, vector<4x128xf32> -> vector<4x128xf32>
    %299 = arith.addf %298, %283 : vector<4x128xf32>
    %300 = arith.addf %299, %8 : vector<4x128xf32>
    %301 = arith.maximumf %252, %297 : vector<4x16xf32>
    %cst_66 = arith.constant 1.000000e+00 : f32
    %302 = vector.broadcast %cst_66 : f32 to vector<4x16xf32>
    %303 = arith.subf %302, %297 : vector<4x16xf32>
    %304 = arith.mulf %255, %303 : vector<4x16xf32>
    %305 = vector.broadcast %287 : vector<4x1xf32> to vector<4x16xf32>
    %306 = arith.subf %285, %305 : vector<4x16xf32>
    %307 = math.exp %306 : vector<4x16xf32>
    %cst_67 = arith.constant dense<0.000000e+00> : vector<4xf32>
    %308 = vector.multi_reduction <add>, %307, %cst_67 [1] : vector<4x16xf32> to vector<4xf32>
    %309 = vector.shape_cast %308 : vector<4xf32> to vector<4x1xf32>
    %310 = math.log %309 : vector<4x1xf32>
    %311 = arith.addf %310, %287 : vector<4x1xf32>
    %312 = vector.broadcast %311 : vector<4x1xf32> to vector<4x16xf32>
    %313 = arith.subf %312, %285 : vector<4x16xf32>
    %314 = arith.mulf %313, %304 : vector<4x16xf32>
    %315 = arith.addf %266, %314 : vector<4x16xf32>
    %c6_i32 = arith.constant 6 : i32
    %316 = arith.negf %300 : vector<4x128xf32>
    %317 = math.exp %316 : vector<4x128xf32>
    %cst_68 = arith.constant 1.000000e+00 : f32
    %318 = vector.broadcast %cst_68 : f32 to vector<4x128xf32>
    %319 = arith.addf %318, %317 : vector<4x128xf32>
    %320 = arith.divf %318, %319 : vector<4x128xf32>
    %321 = math.tanh %300 : vector<4x128xf32>
    %322 = vector.extract_strided_slice %320 {offsets = [0, 0], sizes = [4, 32], strides = [1, 1]} : vector<4x128xf32> to vector<4x32xf32>
    %323 = vector.extract_strided_slice %320 {offsets = [0, 32], sizes = [4, 32], strides = [1, 1]} : vector<4x128xf32> to vector<4x32xf32>
    %324 = vector.extract_strided_slice %321 {offsets = [0, 64], sizes = [4, 32], strides = [1, 1]} : vector<4x128xf32> to vector<4x32xf32>
    %325 = vector.extract_strided_slice %320 {offsets = [0, 96], sizes = [4, 32], strides = [1, 1]} : vector<4x128xf32> to vector<4x32xf32>
    %326 = arith.mulf %323, %279 : vector<4x32xf32>
    %327 = arith.mulf %322, %324 : vector<4x32xf32>
    %328 = arith.addf %326, %327 : vector<4x32xf32>
    %329 = math.tanh %328 : vector<4x32xf32>
    %330 = arith.mulf %325, %329 : vector<4x32xf32>
    %cst_69 = arith.constant dense<0.000000e+00> : vector<4x144xf32>
    %331 = tpu.matmul %330, %12, %cst_69 {dimension_numbers = #tpu.dot_dimension_numbers<[1], [0], [0], [1], [0, 0, 1, 1], [], []>} : vector<4x32xf32>, vector<32x144xf32>, vector<4x144xf32> -> vector<4x144xf32>
    %332 = vector.extract_strided_slice %331 {offsets = [0, 0], sizes = [4, 128], strides = [1, 1]} : vector<4x144xf32> to vector<4x128xf32>
    %333 = vector.extract_strided_slice %331 {offsets = [0, 128], sizes = [4, 16], strides = [1, 1]} : vector<4x144xf32> to vector<4x16xf32>
    %334 = arith.addf %333, %11 : vector<4x16xf32>
    %cst_70 = arith.constant dense<0xFF800000> : vector<4xf32>
    %335 = vector.multi_reduction <maximumf>, %334, %cst_70 [1] : vector<4x16xf32> to vector<4xf32>
    %336 = vector.shape_cast %335 : vector<4xf32> to vector<4x1xf32>
    %337 = vector.broadcast %336 : vector<4x1xf32> to vector<4x16xf32>
    %338 = arith.cmpf oeq, %334, %337 : vector<4x16xf32>
    %c16_i32_71 = arith.constant 16 : i32
    %339 = vector.broadcast %c16_i32_71 : i32 to vector<4x16xi32>
    %340 = arith.select %338, %14, %339 : vector<4x16xi1>, vector<4x16xi32>
    %cst_72 = arith.constant dense<2147483647> : vector<4xi32>
    %341 = vector.multi_reduction <minsi>, %340, %cst_72 [1] : vector<4x16xi32> to vector<4xi32>
    %342 = vector.shape_cast %341 : vector<4xi32> to vector<4x1xi32>
    %343 = vector.broadcast %342 : vector<4x1xi32> to vector<4x16xi32>
    %344 = arith.cmpi eq, %14, %343 : vector<4x16xi32>
    %345 = arith.extui %344 : vector<4x16xi1> to vector<4x16xi32>
    %346 = arith.sitofp %345 : vector<4x16xi32> to vector<4x16xf32>
    %cst_73 = arith.constant dense<0.000000e+00> : vector<4x128xf32>
    %347 = tpu.matmul %346, %13, %cst_73 {dimension_numbers = #tpu.dot_dimension_numbers<[1], [0], [0], [1], [0, 0, 1, 1], [], []>} : vector<4x16xf32>, vector<16x128xf32>, vector<4x128xf32> -> vector<4x128xf32>
    %348 = arith.addf %347, %332 : vector<4x128xf32>
    %349 = arith.addf %348, %8 : vector<4x128xf32>
    %350 = arith.maximumf %301, %346 : vector<4x16xf32>
    %cst_74 = arith.constant 1.000000e+00 : f32
    %351 = vector.broadcast %cst_74 : f32 to vector<4x16xf32>
    %352 = arith.subf %351, %346 : vector<4x16xf32>
    %353 = arith.mulf %304, %352 : vector<4x16xf32>
    %354 = vector.broadcast %336 : vector<4x1xf32> to vector<4x16xf32>
    %355 = arith.subf %334, %354 : vector<4x16xf32>
    %356 = math.exp %355 : vector<4x16xf32>
    %cst_75 = arith.constant dense<0.000000e+00> : vector<4xf32>
    %357 = vector.multi_reduction <add>, %356, %cst_75 [1] : vector<4x16xf32> to vector<4xf32>
    %358 = vector.shape_cast %357 : vector<4xf32> to vector<4x1xf32>
    %359 = math.log %358 : vector<4x1xf32>
    %360 = arith.addf %359, %336 : vector<4x1xf32>
    %361 = vector.broadcast %360 : vector<4x1xf32> to vector<4x16xf32>
    %362 = arith.subf %361, %334 : vector<4x16xf32>
    %363 = arith.mulf %362, %353 : vector<4x16xf32>
    %364 = arith.addf %315, %363 : vector<4x16xf32>
    %c7_i32 = arith.constant 7 : i32
    %365 = arith.negf %349 : vector<4x128xf32>
    %366 = math.exp %365 : vector<4x128xf32>
    %cst_76 = arith.constant 1.000000e+00 : f32
    %367 = vector.broadcast %cst_76 : f32 to vector<4x128xf32>
    %368 = arith.addf %367, %366 : vector<4x128xf32>
    %369 = arith.divf %367, %368 : vector<4x128xf32>
    %370 = math.tanh %349 : vector<4x128xf32>
    %371 = vector.extract_strided_slice %369 {offsets = [0, 0], sizes = [4, 32], strides = [1, 1]} : vector<4x128xf32> to vector<4x32xf32>
    %372 = vector.extract_strided_slice %369 {offsets = [0, 32], sizes = [4, 32], strides = [1, 1]} : vector<4x128xf32> to vector<4x32xf32>
    %373 = vector.extract_strided_slice %370 {offsets = [0, 64], sizes = [4, 32], strides = [1, 1]} : vector<4x128xf32> to vector<4x32xf32>
    %374 = vector.extract_strided_slice %369 {offsets = [0, 96], sizes = [4, 32], strides = [1, 1]} : vector<4x128xf32> to vector<4x32xf32>
    %375 = arith.mulf %372, %328 : vector<4x32xf32>
    %376 = arith.mulf %371, %373 : vector<4x32xf32>
    %377 = arith.addf %375, %376 : vector<4x32xf32>
    %378 = math.tanh %377 : vector<4x32xf32>
    %379 = arith.mulf %374, %378 : vector<4x32xf32>
    %cst_77 = arith.constant dense<0.000000e+00> : vector<4x144xf32>
    %380 = tpu.matmul %379, %12, %cst_77 {dimension_numbers = #tpu.dot_dimension_numbers<[1], [0], [0], [1], [0, 0, 1, 1], [], []>} : vector<4x32xf32>, vector<32x144xf32>, vector<4x144xf32> -> vector<4x144xf32>
    %381 = vector.extract_strided_slice %380 {offsets = [0, 0], sizes = [4, 128], strides = [1, 1]} : vector<4x144xf32> to vector<4x128xf32>
    %382 = vector.extract_strided_slice %380 {offsets = [0, 128], sizes = [4, 16], strides = [1, 1]} : vector<4x144xf32> to vector<4x16xf32>
    %383 = arith.addf %382, %11 : vector<4x16xf32>
    %cst_78 = arith.constant dense<0xFF800000> : vector<4xf32>
    %384 = vector.multi_reduction <maximumf>, %383, %cst_78 [1] : vector<4x16xf32> to vector<4xf32>
    %385 = vector.shape_cast %384 : vector<4xf32> to vector<4x1xf32>
    %386 = vector.broadcast %385 : vector<4x1xf32> to vector<4x16xf32>
    %387 = arith.cmpf oeq, %383, %386 : vector<4x16xf32>
    %c16_i32_79 = arith.constant 16 : i32
    %388 = vector.broadcast %c16_i32_79 : i32 to vector<4x16xi32>
    %389 = arith.select %387, %14, %388 : vector<4x16xi1>, vector<4x16xi32>
    %cst_80 = arith.constant dense<2147483647> : vector<4xi32>
    %390 = vector.multi_reduction <minsi>, %389, %cst_80 [1] : vector<4x16xi32> to vector<4xi32>
    %391 = vector.shape_cast %390 : vector<4xi32> to vector<4x1xi32>
    %392 = vector.broadcast %391 : vector<4x1xi32> to vector<4x16xi32>
    %393 = arith.cmpi eq, %14, %392 : vector<4x16xi32>
    %394 = arith.extui %393 : vector<4x16xi1> to vector<4x16xi32>
    %395 = arith.sitofp %394 : vector<4x16xi32> to vector<4x16xf32>
    %cst_81 = arith.constant dense<0.000000e+00> : vector<4x128xf32>
    %396 = tpu.matmul %395, %13, %cst_81 {dimension_numbers = #tpu.dot_dimension_numbers<[1], [0], [0], [1], [0, 0, 1, 1], [], []>} : vector<4x16xf32>, vector<16x128xf32>, vector<4x128xf32> -> vector<4x128xf32>
    %397 = arith.addf %396, %381 : vector<4x128xf32>
    %398 = arith.addf %397, %8 : vector<4x128xf32>
    %399 = arith.maximumf %350, %395 : vector<4x16xf32>
    %cst_82 = arith.constant 1.000000e+00 : f32
    %400 = vector.broadcast %cst_82 : f32 to vector<4x16xf32>
    %401 = arith.subf %400, %395 : vector<4x16xf32>
    %402 = arith.mulf %353, %401 : vector<4x16xf32>
    %403 = vector.broadcast %385 : vector<4x1xf32> to vector<4x16xf32>
    %404 = arith.subf %383, %403 : vector<4x16xf32>
    %405 = math.exp %404 : vector<4x16xf32>
    %cst_83 = arith.constant dense<0.000000e+00> : vector<4xf32>
    %406 = vector.multi_reduction <add>, %405, %cst_83 [1] : vector<4x16xf32> to vector<4xf32>
    %407 = vector.shape_cast %406 : vector<4xf32> to vector<4x1xf32>
    %408 = math.log %407 : vector<4x1xf32>
    %409 = arith.addf %408, %385 : vector<4x1xf32>
    %410 = vector.broadcast %409 : vector<4x1xf32> to vector<4x16xf32>
    %411 = arith.subf %410, %383 : vector<4x16xf32>
    %412 = arith.mulf %411, %402 : vector<4x16xf32>
    %413 = arith.addf %364, %412 : vector<4x16xf32>
    %c0_84 = arith.constant 0 : index
    %c0_85 = arith.constant 0 : index
    %414 = vector.load %arg9[%c0_84, %c0_85] : memref<4x16xf32, #tpu.memory_space<vmem>>, vector<4x16xf32>
    tpu.vector_store %arg9[%c0_84, %c0_85], %399 {strides = array<i32>} : memref<4x16xf32, #tpu.memory_space<vmem>>, vector<4x16xf32>,
    %415 = vector.shape_cast %413 : vector<4x16xf32> to vector<1x4x16xf32>
    %cst_86 = arith.constant dense<0.000000e+00> : vector<1xf32>
    %416 = vector.multi_reduction <add>, %415, %cst_86 [1, 2] : vector<1x4x16xf32> to vector<1xf32>
    %417 = vector.shape_cast %416 : vector<1xf32> to vector<1x1x1xf32>
    %418 = vector.extract %417[0, 0, 0] : f32 from vector<1x1x1xf32>
    %cst_87 = arith.constant 0.001953125 : f32
    %419 = arith.mulf %418, %cst_87 : f32
    %c0_88 = arith.constant 0 : index
    %c0_89 = arith.constant 0 : index
    %420 = memref.load %arg10[%c0_88, %c0_89] : memref<1x1xf32, #tpu.memory_space<smem>>
    memref.store %419, %arg10[%c0_88, %c0_89] : memref<1x1xf32, #tpu.memory_space<smem>>
    return
  }
}

</mosaic_0001>

<bundles_post_ra>
// kernel: tpu_custom_call.1
= control target key start
LH: loop header
LB: loop body
LE: loop exit
PB: predicated region body
PF: predicated region fallthrough
CT: control target
= control target key end

     0   :  { %16 = vsyncpa [#allocation3], 0  ;;  %s2235_s0 = inlined_call_operand.hbm [shape: f32[4,32], index: 0, kind: input, shape index: {}]   ;;  %s2236_s1 = inlined_call_operand.hbm [shape: f32[4,16], index: 1, kind: input, shape index: {}]   ;;  %s2237_s2 = inlined_call_operand.hbm [shape: f32[32,32], index: 2, kind: input, shape index: {}]   ;;  %s2238_s3 = inlined_call_operand.vmem [shape: f32[1,32], index: 3, kind: input, shape index: {}]   ;;  %s2239_s4 = inlined_call_operand.hbm [shape: f32[32,128], index: 4, kind: input, shape index: {}]   ;;  %s2240_s5 = inlined_call_operand.vmem [shape: f32[1,128], index: 5, kind: input, shape index: {}]   ;;  %s2241_s6 = inlined_call_operand.hbm [shape: f32[32,144], index: 6, kind: input, shape index: {}]   ;;  %s2242_s7 = inlined_call_operand.vmem [shape: f32[1,16], index: 7, kind: input, shape index: {}]   ;;  %s2243_s8 = inlined_call_operand.hbm [shape: f32[16,128], index: 8, kind: input, shape index: {}]   ;;  %s2244_s9 = inlined_call_operand.hbm [shape: f32[4,16], index: 9, kind: output, shape index: {0}]   ;;  %s2245_s10 = inlined_call_operand.hbm [shape: f32[1,1], index: 10, kind: output, shape index: {1}]  }
   0x1   :  { %17 = vsyncpa [#allocation7], 0 }
   0x2   :  { %18 = vsyncpa [#allocation10], 0 }
   0x3   :  { %19 = vsyncpa [#allocation13], 0 }
   0x4   :  { %20 = vsyncpa [#allocation4], 0  ;;  %s38_s15 = sshll.u32 %s2236_s1, 4  ;;  %s39_s15 = int_to_ptr.hbm [resolvable:$true] %s38_s15 }
   0x5   :  { %21 = vsyncpa [#allocation5], 0  ;;  %s1724_s16 = smov [#allocation6]   ;;  %s63_s20 = sshll.u32 %s2239_s4, 4  ;;  %s64_s20 = int_to_ptr.hbm [resolvable:$true] %s63_s20 }
   0x6   :  { %s40_s17 = sshll.u32 %s1724_s16, 4  ;;  %s1725_s21 = smov [#allocation9]   ;;  %s41_s17 = int_to_ptr.vmem [resolvable:$true] %s40_s17 }
   0x7   :  { %43 = dma.hbm_to_vmem [thread:$0]  %s39_s15, 64, %s41_s17, [#allocation7]  }
   0x8   :  { %s65_s22 = sshll.u32 %s1725_s21, 4  ;;  %s27_s25 = sshll.u32 %s2235_s0, 4  ;;  %s66_s22 = int_to_ptr.vmem [resolvable:$true] %s65_s22  ;;  %s28_s25 = int_to_ptr.hbm [resolvable:$true] %s27_s25 }
   0x9   :  { %s1726_s1 = smov 128   ;;  %s1727_s26 = smov 8  }
   0xa   :  { %71 = dma.hbm_to_vmem [thread:$0]  %s64_s20, 512, %s66_s22, [#allocation10], %s1726_s1, %s1726_s1, %s1727_s26  }
   0xb   :  { %s48_s29 = sshll.u32 %s2237_s2, 4  ;;  %s1728_s30 = smov [#allocation2]   ;;  %s49_s29 = int_to_ptr.hbm [resolvable:$true] %s48_s29 }
   0xc   :  { %s29_s11 = sshll.u32 %s1728_s30, 4  ;;  %s1729_s4 = smov [#allocation8]   ;;  %s30_s11 = int_to_ptr.vmem [resolvable:$true] %s29_s11 }
   0xd   :  { %32 = dma.hbm_to_vmem [thread:$0]  %s28_s25, 64, %s30_s11, [#allocation3]  }
   0xe   :  { %s50_s12 = sshll.u32 %s1729_s4, 4  ;;  %s78_s0 = sshll.u32 %s2241_s6, 4  ;;  %s51_s12 = int_to_ptr.vmem [resolvable:$true] %s50_s12  ;;  %s79_s0 = int_to_ptr.hbm [resolvable:$true] %s78_s0 }
   0xf   :  { %56 = dma.hbm_to_vmem [thread:$0]  %s49_s29, 512, %s51_s12, [#allocation7], %s1726_s1, %s1726_s1, %s1727_s26  }
  0x10   :  { %s1730_s15 = smov [#allocation11]   ;;  %s93_s2 = sshll.u32 %s2243_s8, 4  ;;  %s94_s2 = int_to_ptr.hbm [resolvable:$true] %s93_s2 }
  0x11   :  { %s80_s16 = sshll.u32 %s1730_s15, 4  ;;  %s1731_s19 = smov 256   ;;  %s81_s16 = int_to_ptr.vmem [resolvable:$true] %s80_s16 }
  0x12   :  { %s1732_s20 = smov 16   ;;  %s1733_s21 = smov [#allocation12]  }
  0x13   :  { %86 = dma.hbm_to_vmem [thread:$0]  %s79_s0, 1024, %s81_s16, [#allocation10], %s1731_s19, %s1731_s19, %s1732_s20  }
  0x14   :  { %s95_s22 = sshll.u32 %s1733_s21, 4  ;;  %s96_s22 = int_to_ptr.vmem [resolvable:$true] %s95_s22 }
  0x15   :  { %101 = dma.hbm_to_vmem [thread:$0]  %s94_s2, 256, %s96_s22, [#allocation13], %s1726_s1, %s1726_s1, %s1727_s26  }
  0x16   :  { %1712 = dma.done.wait [#allocation3], 64  }
  0x17   :  { %1713 = vsyncadd [#allocation3], 4294967232 }
  0x18   :  { %1714 = dma.done.wait [#allocation7], 576  }
  0x19   :  { %1715 = vsyncadd [#allocation7], 4294966720 }
  0x1a   :  { %1716 = dma.done.wait [#allocation10], 1536  }
  0x1b   :  { %1717 = vsyncadd [#allocation10], 4294965760 }
  0x1c   :  { %1718 = dma.done.wait [#allocation13], 256  }
  0x1d   :  { %1719 = vsyncadd [#allocation13], 4294967040  ;;  %v130_v0 = vld [vmem:[#allocation8 + $0x18] sm:$0xff]  ;;  %v129_v1 = vld [vmem:[#allocation8 + $0x10] sm:$0xff]  ;;  %vm135_vm0 = vcmask 261120   ;;  %s1734_s25 = smov 64   ;;  %v177_v50 = vlaneseq }
  0x1e   :  { %151 = vmatpush.msra.mxu0 %v130_v0  ;;  %v182_v2 = vld [vmem:[#allocation9 + $0x18] sm:$0xff]  ;;  %v128_v3 = vld [vmem:[#allocation8 + $0x8] sm:$0xff]  ;;  %v181_v4 = vld [vmem:[#allocation9 + $0x10] sm:$0xff]  ;;  %vm290_vm5 = vcmask 125952   ;;  %vm314_vm8 = vcmask 130048   ;;  %s1346_s12 = sshll.u32 %s2244_s9, 4  ;;  %s1347_s12 = int_to_ptr.hbm [resolvable:$true] %s1346_s12 }
  0x1f   :  { %198 = vmatpush.msra.mxu1 %v182_v2  ;;  %v127_v5 = vld [vmem:[#allocation8] sm:$0xff]  ;;  %v126_v6 = vld [vmem:[#allocation2] sm:$0xf]  ;;  %v180_v7 = vld [vmem:[#allocation9 + $0x8] sm:$0xff]  ;;  %v1878_v51 = vand.u32 127, %v177_v50  ;;  %s1355_s0 = sshll.u32 %s2245_s10, 4  ;;  %s1356_s0 = int_to_ptr.hbm [resolvable:$true] %s1355_s0 }
  0x20   :  { %152 = vmatpush.msra.mxu0 %v129_v1  ;;  %v179_v8 = vld [vmem:[#allocation9] sm:$0xff]  ;;  %v1431_v9 = vld [vmem:[%s2238_s3] ss:$0 sm:$0xff]  ;;  %s1735_s3 = smov 32   ;;  %v1829_v35 = vld [vmem:[#allocation11 + $0x30] sm:$0xff]  ;;  %s1738_s9 = smov [#allocation15]  }
  0x21   :  { %199 = vmatpush.msra.mxu1 %v181_v4  ;;  %v1820_v12 = vld [vmem:[%s2240_s5] ss:$0 sm:$0xff]  ;;  %v1833_v37 = vld [vmem:[#allocation11 + $0x20] sm:$0xff]  ;;  %261 = vmatpush.msra.mxu2 %v1829_v35  ;;  %v1837_v38 = vld [vmem:[#allocation11 + $0x28] sm:$0xff]  ;;  %v1736_v4 = vmov 0.0  }
  0x22   :  { %153 = vmatpush.msra.mxu0 %v128_v3  ;;  %v1831_v36 = vld [vmem:[#allocation11 + $0x38] sm:$0xff]  ;;  %v1839_v39 = vld [vmem:[#allocation11 + $0x10] sm:$0xff]  ;;  %v1846_v41 = vld [vmem:[#allocation11] sm:$0xff] }
  0x23   :  { %200 = vmatpush.msra.mxu1 %v180_v7  ;;  %281 = vmatpush.msra.mxu3 %v1831_v36  ;;  %v1841_v40 = vld [vmem:[#allocation11 + $0x18] sm:$0xff]  ;;  %v1848_v42 = vld [vmem:[#allocation11 + $0x8] sm:$0xff]  ;;  %v1891_v62 = vld [vmem:[#allocation12] sm:$0xff] }
  0x24   :  { %154 = vmatpush.msra.mxu0 %v127_v5  ;;  %262 = vmatpush.msra.mxu2 %v1833_v37  ;;  %v1871_v46 = vld [vmem:[%s2242_s7] ss:$0 sm:$0xff]  ;;  %v1886_v57 = vld [vmem:[#allocation12 + $0x8] sm:$0xff] }
  0x25   :  { %1374 = vmatmul.msk.f32.vlgmr.msra.gmra.mxu0 %vm135_vm0, %v126_v6  ;;  %201 = vmatpush.msra.mxu1 %v179_v8 }
  0x26   :  { %282 = vmatpush.msra.mxu3 %v1837_v38  ;;  %263 = vmatpush.msra.mxu2 %v1839_v39 }
  0x27   :  { %408 = vmatpush.msrb.mxu1 %v1829_v35  ;;  %332 = vmatpush.msrb.mxu0 %v1886_v57 }
  0x28   :  { %283 = vmatpush.msra.mxu3 %v1841_v40  ;;  %264 = vmatpush.msra.mxu2 %v1846_v41 }
  0x29   :  { %409 = vmatpush.msrb.mxu1 %v1833_v37  ;;  %333 = vmatpush.msrb.mxu0 %v1891_v62 }
  0x2a   :  { %284 = vmatpush.msra.mxu3 %v1848_v42  ;;  %428 = vmatpush.msrb.mxu2 %v1831_v36 }
  0x2b   :  { %410 = vmatpush.msrb.mxu1 %v1839_v39  ;;  %553 = vmatpush.msra.mxu0 %v1829_v35 }
  0x2c   :  { %429 = vmatpush.msrb.mxu2 %v1837_v38  ;;  %477 = vmatpush.msrb.mxu3 %v1886_v57 }
  0x2d   :  { %411 = vmatpush.msrb.mxu1 %v1846_v41  ;;  %554 = vmatpush.msra.mxu0 %v1833_v37 }
  0x2e   :  { %430 = vmatpush.msrb.mxu2 %v1841_v40  ;;  %478 = vmatpush.msrb.mxu3 %v1891_v62 }
  0x2f   :  { %555 = vmatpush.msra.mxu0 %v1839_v39 }
  0x30   :  { %431 = vmatpush.msrb.mxu2 %v1848_v42 }
  0x31   :  { %556 = vmatpush.msra.mxu0 %v1846_v41 }
  0xa2   :  { %v156_v10 = vpop.f32.mrf.mxu0 }
  0xa3   :  { %v157_v11 = vadd.f32 %v1431_v9, %v156_v10 }
  0xa5   :  { %1375 = vmatmul.msk.f32.vlgmr.msra.gmra.mxu1 %vm135_vm0, %v157_v11 }
  0xa6   :  { %573 = vmatpush.msra.mxu1 %v1831_v36 }
  0xa8   :  { %574 = vmatpush.msra.mxu1 %v1837_v38 }
  0xaa   :  { %575 = vmatpush.msra.mxu1 %v1841_v40 }
  0xac   :  { %576 = vmatpush.msra.mxu1 %v1848_v42 }
 0x122   :  { %v203_v13 = vpop.f32.mrf.mxu1 }
 0x123   :  { %v204_v14 = vadd.f32 %v1820_v12, %v203_v13 }
 0x125   :  { %1434 = vtanh.f32 %v204_v14  ;;  %v1376_v16 = vmul.f32 -1.442695, %v204_v14 }
 0x127   :  { %1436 = vpow2.f32 %v1376_v16 }
 0x12b   :  { %v1435_v15 = vpop.eup %1434 }
 0x12c   :  { %229 = vrot.lane.b32.xlu0 %v1435_v15, %s1734_s25 }
 0x12d   :  { %v1437_v17 = vpop.eup %1436 }
 0x12e   :  { %v210_v18 = vadd.f32 1.0, %v1437_v17 }
 0x130   :  { %1438 = vrcp.f32 %v210_v18  ;;  %v222_v24 = vand.u32 2147483648, %v210_v18  ;;  %vm216_vm2 = vweird.f32 %v210_v18  ;;  %v220_v25 = vand.u32 2147483647, %v210_v18 }
 0x132   :  { %v223_v27 = vor.u32 1.1754944e-38, %v222_v24  ;;  %vm221_vm4 = vcmp.eq.f32.partialorder %v220_v25, 8.507059e+37 }
 0x136   :  { %v1439_v19 = vpop.eup %1438 }
 0x137   :  { %v212_v20 = vmul.f32 %v1439_v19, %v210_v18  ;;  %vm217_vm1 = vweird.f32 %v1439_v19 }
 0x138   :  { %vm218_vm3 = vmor %vm216_vm2, %vm217_vm1 }
 0x139   :  { %v213_v21 = vsub.f32 1.0, %v212_v20 }
 0x13b   :  { %v214_v22 = vmul.f32 %v1439_v19, %v213_v21 }
 0x13d   :  { %v215_v23 = vadd.f32 %v1439_v19, %v214_v22 }
 0x13f   :  { %v219_v26 = vsel %vm218_vm3, %v1439_v19, %v215_v23 }
 0x140   :  { %v224_v29 = vsel %vm221_vm4, %v223_v27, %v219_v26 }
 0x141   :  { %v227_v31 = vmul.f32 0.0, %v224_v29 }
 0x19e   :  { %v230_v28 = vpop.permute.xlu0 %229 }
 0x19f   :  { %v232_v30 = vmul.f32 %v230_v28, %v224_v29 }
 0x1a1   :  { %234 = vrot.lane.b32.xlu0 %v232_v30, %s1735_s3 }
 0x213   :  { %v235_v32 = vpop.permute.xlu0 %234 }
 0x214   :  { %v1825_v33 = vadd.f32 %v235_v32, %v227_v31 }
 0x216   :  { %1440 = vtanh.f32 %v1825_v33 }
 0x21c   :  { %v1441_v34 = vpop.eup %1440 }
 0x21d   :  { %240 = vrot.lane.b32.xlu1 %v1441_v34, %s1734_s25 }
 0x28f   :  { %v241_v43 = vpop.permute.xlu1 %240 }
 0x290   :  { %v243_v44 = vmul.f32 %v241_v43, %v224_v29 }
 0x292   :  { %245 = vrot.lane.b32.xlu1 %v243_v44, %s1735_s3 }
 0x304   :  { %v246_v45 = vpop.permute.xlu1 %245 }
 0x305   :  { %1377 = vmatmul.msk.f32.vlgmr.msra.gmra.mxu2 %vm135_vm0, %v246_v45  ;;  %1378 = vmatmul.msk.f32.vlgmr.msra.gmra.mxu3 %vm135_vm0, %v246_v45 }
 0x306   :  { %622 = vmatpush.msra.mxu2 %v1886_v57  ;;  %698 = vmatpush.msra.mxu3 %v1829_v35 }
 0x308   :  { %623 = vmatpush.msra.mxu2 %v1891_v62  ;;  %699 = vmatpush.msra.mxu3 %v1833_v37 }
 0x30a   :  { %700 = vmatpush.msra.mxu3 %v1839_v39 }
 0x30c   :  { %701 = vmatpush.msra.mxu3 %v1846_v41 }
 0x388   :  { %v286_v47 = vpop.f32.mrf.mxu3  ;;  %v266_v6 = vpop.f32.mrf.mxu2 }
 0x389   :  { %v1874_v48 = vadd.f32 %v1871_v46, %v286_v47 }
 0x38b   :  { %v291_v49 = vsel %vm290_vm5, %v1874_v48, -inf }
 0x38c   :  { %292 = vmax.xlane.f32.xlu2 %v291_v49 }
 0x3ff   :  { %v1880_v52 = vpop.xlane.xlu2 %292 }
 0x400   :  { %vm294_vm6 = vcmp.eq.f32.partialorder %v1874_v48, %v1880_v52 }
 0x401   :  { %v295_v53 = vsel %vm294_vm6, %v1878_v51, 16 }
 0x402   :  { %v296_v54 = vsel %vm290_vm5, %v295_v53, 2147483647 }
 0x403   :  { %v298_v55 = vshra.s32 %v296_v54, 16  ;;  %v297_v58 = vand.u32 65535, %v296_v54 }
 0x405   :  { %v300_v56 = vcvt.s32.f32 %v298_v55  ;;  %v299_v60 = vcvt.s32.f32 %v297_v58 }
 0x407   :  { %301 = vmin.xlane.f32.xlu2 %v300_v56 }
 0x47a   :  { %v302_v59 = vpop.xlane.xlu2 %301 }
 0x47b   :  { %vm303_vm7 = vcmp.eq.f32.partialorder %v300_v56, %v302_v59  ;;  %v308_v63 = vcvt.f32.s32 %v302_v59 }
 0x47c   :  { %v304_v61 = vsel %vm303_vm7, %v299_v60, inf }
 0x47d   :  { %305 = vmin.xlane.f32.xlu0 %v304_v61  ;;  %v309_v1 = vshll.u32 %v308_v63, 16 }
 0x4f0   :  { %v306_v0 = vpop.xlane.xlu0 %305 }
 0x4f1   :  { %v307_v2 = vcvt.f32.s32 %v306_v0 }
 0x4f3   :  { %v310_v3 = vadd.s32 %v309_v1, %v307_v2  ;;  %v206_v2 = vld [vmem:[#allocation6] sm:$0xf] }
 0x4f5   :  { %vm311_vm9 = vcmp.eq.s32.totalorder %v1878_v51, %v310_v3 }
 0x4f6   :  { %v1906_v5 = vsel %vm311_vm9, 1.0, %v1736_v4 }
 0x4f7   :  { %1380 = vmatmul.msk.f32.vlgmr.msrb.gmra.mxu0 %vm314_vm8, %v1906_v5  ;;  %v340_v0 = vsub.f32 1.0, %v1906_v5  ;;  %v339_v3 = vmax.f32 %v1906_v5, 0.0 }
 0x4f8   :  { %718 = vmatpush.msrb.mxu0 %v1831_v36 }
 0x4fa   :  { %719 = vmatpush.msrb.mxu0 %v1837_v38 }
 0x4fc   :  { %720 = vmatpush.msrb.mxu0 %v1841_v40 }
 0x4fe   :  { %721 = vmatpush.msrb.mxu0 %v1848_v42 }
 0x574   :  { %v335_v7 = vpop.f32.mrf.mxu0 }
 0x575   :  { %v336_v8 = vadd.f32 %v335_v7, %v266_v6  ;;  %v1946_v7 = vmul.f32 %v340_v0, %v206_v2 }
 0x577   :  { %v338_v9 = vadd.f32 %v1820_v12, %v336_v8 }
 0x579   :  { %1442 = vtanh.f32 %v338_v9  ;;  %v1381_v11 = vmul.f32 -1.442695, %v338_v9 }
 0x57b   :  { %1444 = vpow2.f32 %v1381_v11 }
 0x57f   :  { %v1443_v10 = vpop.eup %1442 }
 0x580   :  { %376 = vrot.lane.b32.xlu1 %v1443_v10, %s1734_s25 }
 0x581   :  { %v1445_v13 = vpop.eup %1444 }
 0x582   :  { %v357_v14 = vadd.f32 1.0, %v1445_v13 }
 0x584   :  { %1446 = vrcp.f32 %v357_v14  ;;  %v369_v20 = vand.u32 2147483648, %v357_v14  ;;  %vm363_vm11 = vweird.f32 %v357_v14  ;;  %v367_v21 = vand.u32 2147483647, %v357_v14 }
 0x586   :  { %v370_v23 = vor.u32 1.1754944e-38, %v369_v20  ;;  %vm368_vm13 = vcmp.eq.f32.partialorder %v367_v21, 8.507059e+37 }
 0x58a   :  { %v1447_v15 = vpop.eup %1446 }
 0x58b   :  { %v359_v16 = vmul.f32 %v1447_v15, %v357_v14  ;;  %vm364_vm10 = vweird.f32 %v1447_v15 }
 0x58c   :  { %vm365_vm12 = vmor %vm363_vm11, %vm364_vm10 }
 0x58d   :  { %v360_v17 = vsub.f32 1.0, %v359_v16 }
 0x58f   :  { %v361_v18 = vmul.f32 %v1447_v15, %v360_v17 }
 0x591   :  { %v362_v19 = vadd.f32 %v1447_v15, %v361_v18 }
 0x593   :  { %v366_v22 = vsel %vm365_vm12, %v1447_v15, %v362_v19 }
 0x594   :  { %v371_v25 = vsel %vm368_vm13, %v370_v23, %v366_v22 }
 0x595   :  { %v374_v27 = vmul.f32 %v371_v25, %v1825_v33 }
 0x5f2   :  { %v377_v24 = vpop.permute.xlu1 %376 }
 0x5f3   :  { %v379_v26 = vmul.f32 %v377_v24, %v371_v25 }
 0x5f5   :  { %381 = vrot.lane.b32.xlu2 %v379_v26, %s1735_s3 }
 0x64f   :  { %v382_v28 = vpop.permute.xlu2 %381 }
 0x650   :  { %v1918_v29 = vadd.f32 %v382_v28, %v374_v27 }
 0x652   :  { %1448 = vtanh.f32 %v1918_v29 }
 0x658   :  { %v1449_v30 = vpop.eup %1448 }
 0x659   :  { %387 = vrot.lane.b32.xlu1 %v1449_v30, %s1734_s25 }
 0x6cb   :  { %v388_v31 = vpop.permute.xlu1 %387 }
 0x6cc   :  { %v390_v32 = vmul.f32 %v388_v31, %v371_v25 }
 0x6ce   :  { %392 = vrot.lane.b32.xlu1 %v390_v32, %s1735_s3 }
 0x740   :  { %v393_v34 = vpop.permute.xlu1 %392 }
 0x741   :  { %1382 = vmatmul.msk.f32.vlgmr.msrb.gmra.mxu1 %vm135_vm0, %v393_v34  ;;  %1383 = vmatmul.msk.f32.vlgmr.msrb.gmra.mxu2 %vm135_vm0, %v393_v34 }
 0x742   :  { %767 = vmatpush.msrb.mxu1 %v1886_v57  ;;  %843 = vmatpush.msrb.mxu2 %v1829_v35 }
 0x744   :  { %768 = vmatpush.msrb.mxu1 %v1891_v62  ;;  %844 = vmatpush.msrb.mxu2 %v1833_v37 }
 0x746   :  { %845 = vmatpush.msrb.mxu2 %v1839_v39 }
 0x748   :  { %846 = vmatpush.msrb.mxu2 %v1846_v41 }
 0x7be   :  { %v413_v5 = vpop.f32.mrf.mxu1 }
 0x7c4   :  { %v433_v33 = vpop.f32.mrf.mxu2 }
 0x7c5   :  { %v1932_v43 = vadd.f32 %v1871_v46, %v433_v33 }
 0x7c7   :  { %v437_v44 = vsel %vm290_vm5, %v1932_v43, -inf }
 0x7c8   :  { %438 = vmax.xlane.f32.xlu1 %v437_v44 }
 0x83b   :  { %v1936_v45 = vpop.xlane.xlu1 %438 }
 0x83c   :  { %vm440_vm14 = vcmp.eq.f32.partialorder %v1932_v43, %v1936_v45 }
 0x83d   :  { %v441_v47 = vsel %vm440_vm14, %v1878_v51, 16 }
 0x83e   :  { %v442_v49 = vsel %vm290_vm5, %v441_v47, 2147483647 }
 0x83f   :  { %v444_v50 = vshra.s32 %v442_v49, 16  ;;  %v443_v54 = vand.u32 65535, %v442_v49 }
 0x841   :  { %v446_v53 = vcvt.s32.f32 %v444_v50  ;;  %v445_v56 = vcvt.s32.f32 %v443_v54 }
 0x843   :  { %447 = vmin.xlane.f32.xlu2 %v446_v53 }
 0x8b6   :  { %v448_v55 = vpop.xlane.xlu2 %447 }
 0x8b7   :  { %vm449_vm15 = vcmp.eq.f32.partialorder %v446_v53, %v448_v55  ;;  %v454_v59 = vcvt.f32.s32 %v448_v55 }
 0x8b8   :  { %v450_v58 = vsel %vm449_vm15, %v445_v56, inf }
 0x8b9   :  { %451 = vmin.xlane.f32.xlu0 %v450_v58  ;;  %v455_v61 = vshll.u32 %v454_v59, 16 }
 0x92c   :  { %v452_v60 = vpop.xlane.xlu0 %451 }
 0x92d   :  { %v453_v63 = vcvt.f32.s32 %v452_v60 }
 0x92f   :  { %v456_v1 = vadd.s32 %v455_v61, %v453_v63 }
 0x931   :  { %vm457_vm1 = vcmp.eq.s32.totalorder %v1878_v51, %v456_v1 }
 0x932   :  { %v1384_v6 = vsel %vm457_vm1, 1.0, %v1736_v4 }
 0x933   :  { %1385 = vmatmul.msk.f32.vlgmr.msrb.gmra.mxu3 %vm314_vm8, %v1384_v6  ;;  %v1949_v8 = vmax.f32 %v339_v3, %v1384_v6  ;;  %v485_v9 = vsub.f32 1.0, %v1384_v6 }
 0x934   :  { %863 = vmatpush.msrb.mxu3 %v1831_v36 }
 0x935   :  { %v1953_v10 = vmul.f32 %v485_v9, %v1946_v7 }
 0x936   :  { %864 = vmatpush.msrb.mxu3 %v1837_v38 }
 0x938   :  { %865 = vmatpush.msrb.mxu3 %v1841_v40 }
 0x93a   :  { %866 = vmatpush.msrb.mxu3 %v1848_v42 }
 0x9b6   :  { %v480_v11 = vpop.f32.mrf.mxu3 }
 0x9b7   :  { %v481_v13 = vadd.f32 %v480_v11, %v413_v5 }
 0x9b9   :  { %v483_v14 = vadd.f32 %v1820_v12, %v481_v13 }
 0x9bb   :  { %1450 = vtanh.f32 %v483_v14  ;;  %v1386_v16 = vmul.f32 -1.442695, %v483_v14 }
 0x9bd   :  { %1452 = vpow2.f32 %v1386_v16 }
 0x9c1   :  { %v1451_v15 = vpop.eup %1450 }
 0x9c2   :  { %521 = vrot.lane.b32.xlu0 %v1451_v15, %s1734_s25 }
 0x9c3   :  { %v1453_v17 = vpop.eup %1452 }
 0x9c4   :  { %v502_v18 = vadd.f32 1.0, %v1453_v17 }
 0x9c6   :  { %1454 = vrcp.f32 %v502_v18  ;;  %v514_v24 = vand.u32 2147483648, %v502_v18  ;;  %vm508_vm3 = vweird.f32 %v502_v18  ;;  %v512_v25 = vand.u32 2147483647, %v502_v18 }
 0x9c8   :  { %v515_v27 = vor.u32 1.1754944e-38, %v514_v24  ;;  %vm513_vm6 = vcmp.eq.f32.partialorder %v512_v25, 8.507059e+37 }
 0x9cc   :  { %v1455_v19 = vpop.eup %1454 }
 0x9cd   :  { %v504_v20 = vmul.f32 %v1455_v19, %v502_v18  ;;  %vm509_vm2 = vweird.f32 %v1455_v19 }
 0x9ce   :  { %vm510_vm4 = vmor %vm508_vm3, %vm509_vm2 }
 0x9cf   :  { %v505_v21 = vsub.f32 1.0, %v504_v20 }
 0x9d1   :  { %v506_v22 = vmul.f32 %v1455_v19, %v505_v21 }
 0x9d3   :  { %v507_v23 = vadd.f32 %v1455_v19, %v506_v22 }
 0x9d5   :  { %v511_v26 = vsel %vm510_vm4, %v1455_v19, %v507_v23 }
 0x9d6   :  { %v516_v30 = vsel %vm513_vm6, %v515_v27, %v511_v26 }
 0x9d7   :  { %v519_v32 = vmul.f32 %v516_v30, %v1918_v29 }
 0xa34   :  { %v522_v28 = vpop.permute.xlu0 %521 }
 0xa35   :  { %v524_v31 = vmul.f32 %v522_v28, %v516_v30 }
 0xa37   :  { %526 = vrot.lane.b32.xlu2 %v524_v31, %s1735_s3 }
 0xa91   :  { %v527_v34 = vpop.permute.xlu2 %526 }
 0xa92   :  { %v1962_v33 = vadd.f32 %v527_v34, %v519_v32 }
 0xa94   :  { %1456 = vtanh.f32 %v1962_v33 }
 0xa9a   :  { %v1457_v44 = vpop.eup %1456 }
 0xa9b   :  { %532 = vrot.lane.b32.xlu1 %v1457_v44, %s1734_s25 }
 0xb0d   :  { %v533_v47 = vpop.permute.xlu1 %532 }
 0xb0e   :  { %v535_v49 = vmul.f32 %v533_v47, %v516_v30 }
 0xb10   :  { %537 = vrot.lane.b32.xlu0 %v535_v49, %s1735_s3 }
 0xb82   :  { %v538_v50 = vpop.permute.xlu0 %537 }
 0xb83   :  { %1387 = vmatmul.msk.f32.vlgmr.msra.gmra.mxu0 %vm135_vm0, %v538_v50  ;;  %1388 = vmatmul.msk.f32.vlgmr.msra.gmra.mxu1 %vm135_vm0, %v538_v50 }
 0xb84   :  { %912 = vmatpush.msra.mxu0 %v1886_v57  ;;  %988 = vmatpush.msra.mxu1 %v1829_v35 }
 0xb86   :  { %913 = vmatpush.msra.mxu0 %v1891_v62  ;;  %989 = vmatpush.msra.mxu1 %v1833_v37 }
 0xb88   :  { %990 = vmatpush.msra.mxu1 %v1839_v39 }
 0xb8a   :  { %991 = vmatpush.msra.mxu1 %v1846_v41 }
 0xc00   :  { %v578_v29 = vpop.f32.mrf.mxu1  ;;  %v558_v16 = vpop.f32.mrf.mxu0 }
 0xc01   :  { %v1976_v53 = vadd.f32 %v1871_v46, %v578_v29 }
 0xc03   :  { %v582_v54 = vsel %vm290_vm5, %v1976_v53, -inf }
 0xc04   :  { %583 = vmax.xlane.f32.xlu0 %v582_v54 }
 0xc77   :  { %v1980_v55 = vpop.xlane.xlu0 %583 }
 0xc78   :  { %vm585_vm7 = vcmp.eq.f32.partialorder %v1976_v53, %v1980_v55 }
 0xc79   :  { %v586_v56 = vsel %vm585_vm7, %v1878_v51, 16 }
 0xc7a   :  { %v587_v58 = vsel %vm290_vm5, %v586_v56, 2147483647 }
 0xc7b   :  { %v589_v59 = vshra.s32 %v587_v58, 16  ;;  %v588_v61 = vand.u32 65535, %v587_v58 }
 0xc7d   :  { %v591_v60 = vcvt.s32.f32 %v589_v59  ;;  %v590_v0 = vcvt.s32.f32 %v588_v61 }
 0xc7f   :  { %592 = vmin.xlane.f32.xlu2 %v591_v60 }
 0xcf2   :  { %v593_v63 = vpop.xlane.xlu2 %592 }
 0xcf3   :  { %vm594_vm9 = vcmp.eq.f32.partialorder %v591_v60, %v593_v63  ;;  %v599_v2 = vcvt.f32.s32 %v593_v63 }
 0xcf4   :  { %v595_v1 = vsel %vm594_vm9, %v590_v0, inf }
 0xcf5   :  { %596 = vmin.xlane.f32.xlu1 %v595_v1  ;;  %v600_v6 = vshll.u32 %v599_v2, 16 }
 0xd68   :  { %v597_v3 = vpop.xlane.xlu1 %596 }
 0xd69   :  { %v598_v9 = vcvt.f32.s32 %v597_v3 }
 0xd6b   :  { %v601_v5 = vadd.s32 %v600_v6, %v598_v9 }
 0xd6d   :  { %vm602_vm10 = vcmp.eq.s32.totalorder %v1878_v51, %v601_v5 }
 0xd6e   :  { %v1988_v11 = vsel %vm602_vm10, 1.0, %v1736_v4 }
 0xd6f   :  { %v629_v13 = vmax.f32 %v1949_v8, %v1988_v11  ;;  %v630_v14 = vsub.f32 1.0, %v1988_v11  ;;  %1390 = vmatmul.msk.f32.vlgmr.msra.gmra.mxu2 %vm314_vm8, %v1988_v11 }
 0xd70   :  { %1008 = vmatpush.msra.mxu2 %v1831_v36 }
 0xd71   :  { %v1997_v15 = vmul.f32 %v630_v14, %v1953_v10 }
 0xd72   :  { %1009 = vmatpush.msra.mxu2 %v1837_v38 }
 0xd74   :  { %1010 = vmatpush.msra.mxu2 %v1841_v40 }
 0xd76   :  { %1011 = vmatpush.msra.mxu2 %v1848_v42 }
 0xdf2   :  { %v625_v17 = vpop.f32.mrf.mxu2 }
 0xdf3   :  { %v626_v18 = vadd.f32 %v625_v17, %v558_v16 }
 0xdf5   :  { %v628_v19 = vadd.f32 %v1820_v12, %v626_v18 }
 0xdf7   :  { %1458 = vtanh.f32 %v628_v19  ;;  %v1391_v21 = vmul.f32 -1.442695, %v628_v19 }
 0xdf9   :  { %1460 = vpow2.f32 %v1391_v21 }
 0xdfd   :  { %v1459_v20 = vpop.eup %1458 }
 0xdfe   :  { %666 = vrot.lane.b32.xlu0 %v1459_v20, %s1734_s25 }
 0xdff   :  { %v1461_v22 = vpop.eup %1460 }
 0xe00   :  { %v647_v23 = vadd.f32 1.0, %v1461_v22 }
 0xe02   :  { %1462 = vrcp.f32 %v647_v23  ;;  %v659_v30 = vand.u32 2147483648, %v647_v23  ;;  %vm653_vm12 = vweird.f32 %v647_v23  ;;  %v657_v31 = vand.u32 2147483647, %v647_v23 }
 0xe04   :  { %v660_v34 = vor.u32 1.1754944e-38, %v659_v30  ;;  %vm658_vm14 = vcmp.eq.f32.partialorder %v657_v31, 8.507059e+37 }
 0xe08   :  { %v1463_v24 = vpop.eup %1462 }
 0xe09   :  { %v649_v25 = vmul.f32 %v1463_v24, %v647_v23  ;;  %vm654_vm11 = vweird.f32 %v1463_v24 }
 0xe0a   :  { %vm655_vm13 = vmor %vm653_vm12, %vm654_vm11 }
 0xe0b   :  { %v650_v26 = vsub.f32 1.0, %v649_v25 }
 0xe0d   :  { %v651_v27 = vmul.f32 %v1463_v24, %v650_v26 }
 0xe0f   :  { %v652_v28 = vadd.f32 %v1463_v24, %v651_v27 }
 0xe11   :  { %v656_v32 = vsel %vm655_vm13, %v1463_v24, %v652_v28 }
 0xe12   :  { %v661_v47 = vsel %vm658_vm14, %v660_v34, %v656_v32 }
 0xe13   :  { %v664_v50 = vmul.f32 %v661_v47, %v1962_v33 }
 0xe70   :  { %v667_v44 = vpop.permute.xlu0 %666 }
 0xe71   :  { %v669_v49 = vmul.f32 %v667_v44, %v661_v47 }
 0xe73   :  { %671 = vrot.lane.b32.xlu2 %v669_v49, %s1735_s3 }
 0xecd   :  { %v672_v29 = vpop.permute.xlu2 %671 }
 0xece   :  { %v2006_v54 = vadd.f32 %v672_v29, %v664_v50 }
 0xed0   :  { %1464 = vtanh.f32 %v2006_v54 }
 0xed6   :  { %v1465_v56 = vpop.eup %1464 }
 0xed7   :  { %677 = vrot.lane.b32.xlu1 %v1465_v56, %s1734_s25 }
 0xf49   :  { %v678_v58 = vpop.permute.xlu1 %677 }
 0xf4a   :  { %v680_v59 = vmul.f32 %v678_v58, %v661_v47 }
 0xf4c   :  { %682 = vrot.lane.b32.xlu0 %v680_v59, %s1735_s3 }
 0xfbe   :  { %v683_v60 = vpop.permute.xlu0 %682 }
 0xfbf   :  { %1392 = vmatmul.msk.f32.vlgmr.msra.gmra.mxu3 %vm135_vm0, %v683_v60  ;;  %1393 = vmatmul.msk.f32.vlgmr.msrb.gmra.mxu0 %vm135_vm0, %v683_v60 }
 0xfc0   :  { %1057 = vmatpush.msra.mxu3 %v1886_v57  ;;  %1133 = vmatpush.msrb.mxu0 %v1829_v35 }
 0xfc2   :  { %1058 = vmatpush.msra.mxu3 %v1891_v62  ;;  %1134 = vmatpush.msrb.mxu0 %v1833_v37 }
 0xfc4   :  { %1135 = vmatpush.msrb.mxu0 %v1839_v39 }
 0xfc6   :  { %1136 = vmatpush.msrb.mxu0 %v1846_v41 }
0x103c   :  { %v723_v33 = vpop.f32.mrf.mxu0 }
0x103d   :  { %v2020_v61 = vadd.f32 %v1871_v46, %v723_v33 }
0x103f   :  { %v727_v63 = vsel %vm290_vm5, %v2020_v61, -inf }
0x1040   :  { %728 = vmax.xlane.f32.xlu0 %v727_v63 }
0x1042   :  { %v703_v22 = vpop.f32.mrf.mxu3 }
0x10b3   :  { %v2024_v0 = vpop.xlane.xlu0 %728 }
0x10b4   :  { %vm730_vm15 = vcmp.eq.f32.partialorder %v2020_v61, %v2024_v0 }
0x10b5   :  { %v731_v35 = vsel %vm730_vm15, %v1878_v51, 16 }
0x10b6   :  { %v732_v37 = vsel %vm290_vm5, %v731_v35, 2147483647 }
0x10b7   :  { %v734_v39 = vshra.s32 %v732_v37, 16  ;;  %v733_v41 = vand.u32 65535, %v732_v37 }
0x10b9   :  { %v736_v1 = vcvt.s32.f32 %v734_v39  ;;  %v735_v3 = vcvt.s32.f32 %v733_v41 }
0x10bb   :  { %737 = vmin.xlane.f32.xlu2 %v736_v1 }
0x112e   :  { %v738_v2 = vpop.xlane.xlu2 %737 }
0x112f   :  { %vm739_vm1 = vcmp.eq.f32.partialorder %v736_v1, %v738_v2  ;;  %v744_v9 = vcvt.f32.s32 %v738_v2 }
0x1130   :  { %v740_v6 = vsel %vm739_vm1, %v735_v3, inf }
0x1131   :  { %741 = vmin.xlane.f32.xlu1 %v740_v6  ;;  %v745_v14 = vshll.u32 %v744_v9, 16 }
0x11a4   :  { %v742_v5 = vpop.xlane.xlu1 %741 }
0x11a5   :  { %v743_v16 = vcvt.f32.s32 %v742_v5 }
0x11a7   :  { %v746_v17 = vadd.s32 %v745_v14, %v743_v16 }
0x11a9   :  { %vm747_vm2 = vcmp.eq.s32.totalorder %v1878_v51, %v746_v17 }
0x11aa   :  { %v1394_v18 = vsel %vm747_vm2, 1.0, %v1736_v4 }
0x11ab   :  { %v2035_v19 = vmax.f32 %v629_v13, %v1394_v18  ;;  %v775_v20 = vsub.f32 1.0, %v1394_v18  ;;  %1395 = vmatmul.msk.f32.vlgmr.msrb.gmra.mxu1 %vm314_vm8, %v1394_v18 }
0x11ac   :  { %1153 = vmatpush.msrb.mxu1 %v1831_v36 }
0x11ad   :  { %v2040_v21 = vmul.f32 %v775_v20, %v1997_v15 }
0x11ae   :  { %1154 = vmatpush.msrb.mxu1 %v1837_v38 }
0x11b0   :  { %1155 = vmatpush.msrb.mxu1 %v1841_v40 }
0x11b2   :  { %1156 = vmatpush.msrb.mxu1 %v1848_v42 }
0x1228   :  { %v770_v23 = vpop.f32.mrf.mxu1 }
0x1229   :  { %v771_v24 = vadd.f32 %v770_v23, %v703_v22 }
0x122b   :  { %v773_v8 = vadd.f32 %v1820_v12, %v771_v24 }
0x122d   :  { %1466 = vtanh.f32 %v773_v8  ;;  %v1396_v13 = vmul.f32 -1.442695, %v773_v8 }
0x122f   :  { %1468 = vpow2.f32 %v1396_v13 }
0x1233   :  { %v1467_v11 = vpop.eup %1466 }
0x1234   :  { %811 = vrot.lane.b32.xlu0 %v1467_v11, %s1734_s25 }
0x1235   :  { %v1469_v25 = vpop.eup %1468 }
0x1236   :  { %v792_v26 = vadd.f32 1.0, %v1469_v25 }
0x1238   :  { %1470 = vrcp.f32 %v792_v26  ;;  %v804_v34 = vand.u32 2147483648, %v792_v26  ;;  %vm798_vm4 = vweird.f32 %v792_v26  ;;  %v802_v44 = vand.u32 2147483647, %v792_v26 }
0x123a   :  { %v805_v49 = vor.u32 1.1754944e-38, %v804_v34  ;;  %vm803_vm7 = vcmp.eq.f32.partialorder %v802_v44, 8.507059e+37 }
0x123e   :  { %v1471_v27 = vpop.eup %1470 }
0x123f   :  { %v794_v28 = vmul.f32 %v1471_v27, %v792_v26  ;;  %vm799_vm3 = vweird.f32 %v1471_v27 }
0x1240   :  { %vm800_vm6 = vmor %vm798_vm4, %vm799_vm3 }
0x1241   :  { %v795_v30 = vsub.f32 1.0, %v794_v28 }
0x1243   :  { %v796_v31 = vmul.f32 %v1471_v27, %v795_v30 }
0x1245   :  { %v797_v32 = vadd.f32 %v1471_v27, %v796_v31 }
0x1247   :  { %v801_v47 = vsel %vm800_vm6, %v1471_v27, %v797_v32 }
0x1248   :  { %v806_v29 = vsel %vm803_vm7, %v805_v49, %v801_v47 }
0x1249   :  { %v809_v58 = vmul.f32 %v806_v29, %v2006_v54 }
0x12a6   :  { %v812_v50 = vpop.permute.xlu0 %811 }
0x12a7   :  { %v814_v56 = vmul.f32 %v812_v50, %v806_v29 }
0x12a9   :  { %816 = vrot.lane.b32.xlu2 %v814_v56, %s1735_s3 }
0x1303   :  { %v817_v59 = vpop.permute.xlu2 %816 }
0x1304   :  { %v2049_v60 = vadd.f32 %v817_v59, %v809_v58 }
0x1306   :  { %1472 = vtanh.f32 %v2049_v60 }
0x130c   :  { %v1473_v33 = vpop.eup %1472 }
0x130d   :  { %822 = vrot.lane.b32.xlu1 %v1473_v33, %s1734_s25 }
0x137f   :  { %v823_v63 = vpop.permute.xlu1 %822 }
0x1380   :  { %v825_v35 = vmul.f32 %v823_v63, %v806_v29 }
0x1382   :  { %827 = vrot.lane.b32.xlu0 %v825_v35, %s1735_s3 }
0x13f4   :  { %v828_v37 = vpop.permute.xlu0 %827 }
0x13f5   :  { %1397 = vmatmul.msk.f32.vlgmr.msrb.gmra.mxu2 %vm135_vm0, %v828_v37  ;;  %1398 = vmatmul.msk.f32.vlgmr.msrb.gmra.mxu3 %vm135_vm0, %v828_v37 }
0x13f6   :  { %1202 = vmatpush.msrb.mxu2 %v1886_v57  ;;  %1278 = vmatpush.msrb.mxu3 %v1831_v36 }
0x13f8   :  { %1203 = vmatpush.msrb.mxu2 %v1891_v62  ;;  %1279 = vmatpush.msrb.mxu3 %v1837_v38 }
0x13fa   :  { %1280 = vmatpush.msrb.mxu3 %v1841_v40 }
0x13fc   :  { %1281 = vmatpush.msrb.mxu3 %v1848_v42 }
0x1478   :  { %v868_v54 = vpop.f32.mrf.mxu3  ;;  %v848_v23 = vpop.f32.mrf.mxu2 }
0x1479   :  { %v2063_v39 = vadd.f32 %v1871_v46, %v868_v54 }
0x147b   :  { %v872_v1 = vsel %vm290_vm5, %v2063_v39, -inf }
0x147c   :  { %873 = vmax.xlane.f32.xlu0 %v872_v1 }
0x14ef   :  { %v2067_v41 = vpop.xlane.xlu0 %873 }
0x14f0   :  { %vm875_vm9 = vcmp.eq.f32.partialorder %v2063_v39, %v2067_v41 }
0x14f1   :  { %v876_v36 = vsel %vm875_vm9, %v1878_v51, 16 }
0x14f2   :  { %v877_v38 = vsel %vm290_vm5, %v876_v36, 2147483647 }
0x14f3   :  { %v879_v40 = vshra.s32 %v877_v38, 16  ;;  %v878_v42 = vand.u32 65535, %v877_v38 }
0x14f5   :  { %v881_v57 = vcvt.s32.f32 %v879_v40  ;;  %v880_v2 = vcvt.s32.f32 %v878_v42 }
0x14f7   :  { %882 = vmin.xlane.f32.xlu2 %v881_v57 }
0x156a   :  { %v883_v62 = vpop.xlane.xlu2 %882 }
0x156b   :  { %vm884_vm10 = vcmp.eq.f32.partialorder %v881_v57, %v883_v62  ;;  %v889_v6 = vcvt.f32.s32 %v883_v62 }
0x156c   :  { %v885_v3 = vsel %vm884_vm10, %v880_v2, inf }
0x156d   :  { %886 = vmin.xlane.f32.xlu1 %v885_v3  ;;  %v890_v5 = vshll.u32 %v889_v6, 16 }
0x15e0   :  { %v887_v9 = vpop.xlane.xlu1 %886 }
0x15e1   :  { %v888_v14 = vcvt.f32.s32 %v887_v9 }
0x15e3   :  { %v891_v16 = vadd.s32 %v890_v5, %v888_v14 }
0x15e5   :  { %vm892_vm11 = vcmp.eq.s32.totalorder %v1878_v51, %v891_v16 }
0x15e6   :  { %v2075_v17 = vsel %vm892_vm11, 1.0, %v1736_v4 }
0x15e7   :  { %v919_v18 = vmax.f32 %v2035_v19, %v2075_v17  ;;  %v920_v20 = vsub.f32 1.0, %v2075_v17  ;;  %1400 = vmatmul.msk.f32.vlgmr.msra.gmra.mxu0 %vm314_vm8, %v2075_v17 }
0x15e9   :  { %v2083_v22 = vmul.f32 %v920_v20, %v2040_v21 }
0x1664   :  { %v915_v24 = vpop.f32.mrf.mxu0 }
0x1665   :  { %v916_v8 = vadd.f32 %v915_v24, %v848_v23 }
0x1667   :  { %v918_v11 = vadd.f32 %v1820_v12, %v916_v8 }
0x1669   :  { %1474 = vtanh.f32 %v918_v11  ;;  %v1401_v25 = vmul.f32 -1.442695, %v918_v11 }
0x166b   :  { %1476 = vpow2.f32 %v1401_v25 }
0x166f   :  { %v1475_v13 = vpop.eup %1474 }
0x1670   :  { %956 = vrot.lane.b32.xlu0 %v1475_v13, %s1734_s25 }
0x1671   :  { %v1477_v26 = vpop.eup %1476 }
0x1672   :  { %v937_v27 = vadd.f32 1.0, %v1477_v26 }
0x1674   :  { %1478 = vrcp.f32 %v937_v27  ;;  %v949_v44 = vand.u32 2147483648, %v937_v27  ;;  %vm943_vm13 = vweird.f32 %v937_v27  ;;  %v947_v47 = vand.u32 2147483647, %v937_v27 }
0x1676   :  { %v950_v50 = vor.u32 1.1754944e-38, %v949_v44  ;;  %vm948_vm15 = vcmp.eq.f32.partialorder %v947_v47, 8.507059e+37 }
0x167a   :  { %v1479_v28 = vpop.eup %1478 }
0x167b   :  { %v939_v30 = vmul.f32 %v1479_v28, %v937_v27  ;;  %vm944_vm12 = vweird.f32 %v1479_v28 }
0x167c   :  { %vm945_vm14 = vmor %vm943_vm13, %vm944_vm12 }
0x167d   :  { %v940_v31 = vsub.f32 1.0, %v939_v30 }
0x167f   :  { %v941_v32 = vmul.f32 %v1479_v28, %v940_v31 }
0x1681   :  { %v942_v34 = vadd.f32 %v1479_v28, %v941_v32 }
0x1683   :  { %v946_v49 = vsel %vm945_vm14, %v1479_v28, %v942_v34 }
0x1684   :  { %v951_v56 = vsel %vm948_vm15, %v950_v50, %v946_v49 }
0x1685   :  { %v954_v59 = vmul.f32 %v951_v56, %v2049_v60 }
0x16e2   :  { %v957_v29 = vpop.permute.xlu0 %956 }
0x16e3   :  { %v959_v58 = vmul.f32 %v957_v29, %v951_v56 }
0x16e5   :  { %961 = vrot.lane.b32.xlu2 %v959_v58, %s1735_s3 }
0x173f   :  { %v962_v33 = vpop.permute.xlu2 %961 }
0x1740   :  { %v2089_v63 = vadd.f32 %v962_v33, %v954_v59 }
0x1742   :  { %1480 = vtanh.f32 %v2089_v63 }
0x1748   :  { %v1481_v35 = vpop.eup %1480 }
0x1749   :  { %967 = vrot.lane.b32.xlu1 %v1481_v35, %s1734_s25 }
0x17bb   :  { %v968_v37 = vpop.permute.xlu1 %967 }
0x17bc   :  { %v970_v54 = vmul.f32 %v968_v37, %v951_v56 }
0x17be   :  { %972 = vrot.lane.b32.xlu0 %v970_v54, %s1735_s3 }
0x1830   :  { %v973_v1 = vpop.permute.xlu0 %972 }
0x1831   :  { %1402 = vmatmul.msk.f32.vlgmr.msra.gmra.mxu1 %vm135_vm0, %v973_v1  ;;  %1403 = vmatmul.msk.f32.vlgmr.msra.gmra.mxu2 %vm135_vm0, %v973_v1 }
0x18ae   :  { %v993_v26 = vpop.f32.mrf.mxu1 }
0x18b4   :  { %v1013_v36 = vpop.f32.mrf.mxu2 }
0x18b5   :  { %v2097_v60 = vadd.f32 %v1871_v46, %v1013_v36 }
0x18b7   :  { %v1017_v38 = vsel %vm290_vm5, %v2097_v60, -inf }
0x18b8   :  { %1018 = vmax.xlane.f32.xlu2 %v1017_v38 }
0x192b   :  { %v2101_v40 = vpop.xlane.xlu2 %1018 }
0x192c   :  { %vm1020_vm1 = vcmp.eq.f32.partialorder %v2097_v60, %v2101_v40 }
0x192d   :  { %v1021_v57 = vsel %vm1020_vm1, %v1878_v51, 16 }
0x192e   :  { %v1022_v42 = vsel %vm290_vm5, %v1021_v57, 2147483647 }
0x192f   :  { %v1024_v62 = vshra.s32 %v1022_v42, 16  ;;  %v1023_v3 = vand.u32 65535, %v1022_v42 }
0x1931   :  { %v1026_v2 = vcvt.s32.f32 %v1024_v62  ;;  %v1025_v9 = vcvt.s32.f32 %v1023_v3 }
0x1933   :  { %1027 = vmin.xlane.f32.xlu0 %v1026_v2 }
0x19a6   :  { %v1028_v6 = vpop.xlane.xlu0 %1027 }
0x19a7   :  { %vm1029_vm2 = vcmp.eq.f32.partialorder %v1026_v2, %v1028_v6  ;;  %v1034_v14 = vcvt.f32.s32 %v1028_v6 }
0x19a8   :  { %v1030_v5 = vsel %vm1029_vm2, %v1025_v9, inf }
0x19a9   :  { %1031 = vmin.xlane.f32.xlu1 %v1030_v5  ;;  %v1035_v20 = vshll.u32 %v1034_v14, 16 }
0x1a1c   :  { %v1032_v16 = vpop.xlane.xlu1 %1031 }
0x1a1d   :  { %v1033_v23 = vcvt.f32.s32 %v1032_v16 }
0x1a1f   :  { %v1036_v24 = vadd.s32 %v1035_v20, %v1033_v23 }
0x1a21   :  { %vm1037_vm3 = vcmp.eq.s32.totalorder %v1878_v51, %v1036_v24 }
0x1a22   :  { %v1404_v8 = vsel %vm1037_vm3, 1.0, %v1736_v4 }
0x1a23   :  { %v2112_v11 = vmax.f32 %v919_v18, %v1404_v8  ;;  %v1065_v13 = vsub.f32 1.0, %v1404_v8  ;;  %1405 = vmatmul.msk.f32.vlgmr.msra.gmra.mxu3 %vm314_vm8, %v1404_v8 }
0x1a25   :  { %v2116_v25 = vmul.f32 %v1065_v13, %v2083_v22 }
0x1aa6   :  { %v1060_v27 = vpop.f32.mrf.mxu3 }
0x1aa7   :  { %v1061_v28 = vadd.f32 %v1060_v27, %v993_v26 }
0x1aa9   :  { %v1063_v30 = vadd.f32 %v1820_v12, %v1061_v28 }
0x1aab   :  { %1482 = vtanh.f32 %v1063_v30  ;;  %v1406_v32 = vmul.f32 -1.442695, %v1063_v30 }
0x1aad   :  { %1484 = vpow2.f32 %v1406_v32 }
0x1ab1   :  { %v1483_v31 = vpop.eup %1482 }
0x1ab2   :  { %1101 = vrot.lane.b32.xlu2 %v1483_v31, %s1734_s25 }
0x1ab3   :  { %v1485_v19 = vpop.eup %1484 }
0x1ab4   :  { %v1082_v17 = vadd.f32 1.0, %v1485_v19 }
0x1ab6   :  { %1486 = vrcp.f32 %v1082_v17  ;;  %v1094_v50 = vand.u32 2147483648, %v1082_v17  ;;  %vm1088_vm6 = vweird.f32 %v1082_v17  ;;  %v1092_v29 = vand.u32 2147483647, %v1082_v17 }
0x1ab8   :  { %v1095_v56 = vor.u32 1.1754944e-38, %v1094_v50  ;;  %vm1093_vm9 = vcmp.eq.f32.partialorder %v1092_v29, 8.507059e+37 }
0x1abc   :  { %v1487_v18 = vpop.eup %1486 }
0x1abd   :  { %v1084_v34 = vmul.f32 %v1487_v18, %v1082_v17  ;;  %vm1089_vm4 = vweird.f32 %v1487_v18 }
0x1abe   :  { %vm1090_vm7 = vmor %vm1088_vm6, %vm1089_vm4 }
0x1abf   :  { %v1085_v44 = vsub.f32 1.0, %v1084_v34 }
0x1ac1   :  { %v1086_v47 = vmul.f32 %v1487_v18, %v1085_v44 }
0x1ac3   :  { %v1087_v49 = vadd.f32 %v1487_v18, %v1086_v47 }
0x1ac5   :  { %v1091_v12 = vsel %vm1090_vm7, %v1487_v18, %v1087_v49  ;;  %v1530_v18 = vld [vmem:[%s2240_s5] ss:$0 sm:$0xff] }
0x1ac6   :  { %v1096_v59 = vsel %vm1093_vm9, %v1095_v56, %v1091_v12 }
0x1ac7   :  { %v1099_v35 = vmul.f32 %v1096_v59, %v2089_v63 }
0x1b0c   :  { %v1102_v58 = vpop.permute.xlu2 %1101 }
0x1b0d   :  { %v1104_v33 = vmul.f32 %v1102_v58, %v1096_v59 }
0x1b0f   :  { %1106 = vrot.lane.b32.xlu0 %v1104_v33, %s1735_s3 }
0x1b81   :  { %v1107_v37 = vpop.permute.xlu0 %1106 }
0x1b82   :  { %v2122_v54 = vadd.f32 %v1107_v37, %v1099_v35 }
0x1b84   :  { %1488 = vtanh.f32 %v2122_v54 }
0x1b8a   :  { %v1489_v1 = vpop.eup %1488 }
0x1b8b   :  { %1112 = vrot.lane.b32.xlu1 %v1489_v1, %s1734_s25 }
0x1bfd   :  { %v1113_v36 = vpop.permute.xlu1 %1112 }
0x1bfe   :  { %v1115_v38 = vmul.f32 %v1113_v36, %v1096_v59 }
0x1c00   :  { %1117 = vrot.lane.b32.xlu2 %v1115_v38, %s1735_s3 }
0x1c5a   :  { %v1118_v57 = vpop.permute.xlu2 %1117 }
0x1c5b   :  { %1407 = vmatmul.msk.f32.vlgmr.msrb.gmra.mxu0 %vm135_vm0, %v1118_v57  ;;  %1408 = vmatmul.msk.f32.vlgmr.msrb.gmra.mxu1 %vm135_vm0, %v1118_v57 }
0x1cd8   :  { %v1158_v42 = vpop.f32.mrf.mxu1  ;;  %v1138_v32 = vpop.f32.mrf.mxu0 }
0x1cd9   :  { %v2130_v63 = vadd.f32 %v1871_v46, %v1158_v42 }
0x1cdb   :  { %v1162_v62 = vsel %vm290_vm5, %v2130_v63, -inf }
0x1cdc   :  { %1163 = vmax.xlane.f32.xlu0 %v1162_v62 }
0x1d4f   :  { %v2134_v2 = vpop.xlane.xlu0 %1163 }
0x1d50   :  { %vm1165_vm10 = vcmp.eq.f32.partialorder %v2130_v63, %v2134_v2 }
0x1d51   :  { %v1166_v3 = vsel %vm1165_vm10, %v1878_v51, 16 }
0x1d52   :  { %v1167_v6 = vsel %vm290_vm5, %v1166_v3, 2147483647 }
0x1d53   :  { %v1169_v9 = vshra.s32 %v1167_v6, 16  ;;  %v1168_v14 = vand.u32 65535, %v1167_v6 }
0x1d55   :  { %v1171_v5 = vcvt.s32.f32 %v1169_v9  ;;  %v1170_v46 = vcvt.s32.f32 %v1168_v14  ;;  %v342_v9 = vsub.f32 %v1874_v48, %v1880_v52  ;;  %v777_v14 = vsub.f32 %v2020_v61, %v2024_v0 }
0x1d57   :  { %1172 = vmin.xlane.f32.xlu2 %v1171_v5 }
0x1dca   :  { %v1173_v16 = vpop.xlane.xlu2 %1172 }
0x1dcb   :  { %vm1174_vm11 = vcmp.eq.f32.partialorder %v1171_v5, %v1173_v16  ;;  %v1179_v23 = vcvt.f32.s32 %v1173_v16  ;;  %v343_v5 = vmul.f32 1.442695, %v342_v9  ;;  %v778_v16 = vmul.f32 1.442695, %v777_v14 }
0x1dcc   :  { %v1175_v20 = vsel %vm1174_vm11, %v1170_v46, inf }
0x1dcd   :  { %1176 = vmin.xlane.f32.xlu1 %v1175_v20  ;;  %v1180_v8 = vshll.u32 %v1179_v23, 16 }
0x1e40   :  { %v1177_v24 = vpop.xlane.xlu1 %1176 }
0x1e41   :  { %v1178_v13 = vcvt.f32.s32 %v1177_v24 }
0x1e43   :  { %v1181_v26 = vadd.s32 %v1180_v8, %v1178_v13 }
0x1e45   :  { %vm1182_vm12 = vcmp.eq.s32.totalorder %v1878_v51, %v1181_v26 }
0x1e46   :  { %v2142_v27 = vsel %vm1182_vm12, 1.0, %v1736_v4 }
0x1e47   :  { %v1210_v28 = vsub.f32 1.0, %v2142_v27  ;;  %1410 = vmatmul.msk.f32.vlgmr.msrb.gmra.mxu2 %vm314_vm8, %v2142_v27  ;;  %v1209_v30 = vmax.f32 %v2112_v11, %v2142_v27 }
0x1e49   :  { %v2150_v31 = vmul.f32 %v1210_v28, %v2116_v25 }
0x1eca   :  { %v1205_v19 = vpop.f32.mrf.mxu2 }
0x1ecb   :  { %v1206_v17 = vadd.f32 %v1205_v19, %v1138_v32 }
0x1ecd   :  { %v1208_v34 = vadd.f32 %v1530_v18, %v1206_v17  ;;  %v487_v17 = vsub.f32 %v1932_v43, %v1936_v45 }
0x1ecf   :  { %1490 = vtanh.f32 %v1208_v34  ;;  %v1411_v47 = vmul.f32 -1.442695, %v1208_v34  ;;  %v488_v18 = vmul.f32 1.442695, %v487_v17 }
0x1ed1   :  { %1492 = vpow2.f32 %v1411_v47 }
0x1ed5   :  { %v1491_v44 = vpop.eup %1490 }
0x1ed6   :  { %1246 = vrot.lane.b32.xlu0 %v1491_v44, %s1734_s25  ;;  %v1531_v44 = vld [vmem:[%s2242_s7] ss:$0 sm:$0xff]  ;;  %s1737_s7 = smov [#allocation14]  }
0x1ed7   :  { %v1493_v49 = vpop.eup %1492  ;;  %s1344_s30 = sshll.u32 %s1737_s7, 4  ;;  %s1345_s30 = int_to_ptr.vmem [resolvable:$true] %s1344_s30 }
0x1ed8   :  { %v1227_v50 = vadd.f32 1.0, %v1493_v49  ;;  %v922_v49 = vsub.f32 %v2063_v39, %v2067_v41 }
0x1eda   :  { %1494 = vrcp.f32 %v1227_v50  ;;  %v1239_v33 = vand.u32 2147483648, %v1227_v50  ;;  %vm1233_vm13 = vweird.f32 %v1227_v50  ;;  %v1237_v35 = vand.u32 2147483647, %v1227_v50 }
0x1edc   :  { %v1240_v1 = vor.u32 1.1754944e-38, %v1239_v33  ;;  %vm1238_vm15 = vcmp.eq.f32.partialorder %v1237_v35, 8.507059e+37  ;;  %v632_v33 = vsub.f32 %v1976_v53, %v1980_v55 }
0x1ee0   :  { %v1495_v29 = vpop.eup %1494 }
0x1ee1   :  { %v1229_v12 = vmul.f32 %v1495_v29, %v1227_v50  ;;  %vm1234_vm8 = vweird.f32 %v1495_v29 }
0x1ee2   :  { %vm1235_vm14 = vmor %vm1233_vm13, %vm1234_vm8 }
0x1ee3   :  { %v1230_v56 = vsub.f32 1.0, %v1229_v12 }
0x1ee5   :  { %v1231_v58 = vmul.f32 %v1495_v29, %v1230_v56 }
0x1ee7   :  { %v1232_v59 = vadd.f32 %v1495_v29, %v1231_v58 }
0x1ee9   :  { %v1236_v37 = vsel %vm1235_vm14, %v1495_v29, %v1232_v59  ;;  %v923_v29 = vmul.f32 1.442695, %v922_v49 }
0x1eea   :  { %v1241_v38 = vsel %vm1238_vm15, %v1240_v1, %v1236_v37 }
0x1eeb   :  { %v1244_v42 = vmul.f32 %v1241_v38, %v2122_v54  ;;  %v1212_v54 = vsub.f32 %v2130_v63, %v2134_v2 }
0x1eed   :  { %v1213_v23 = vmul.f32 1.442695, %v1212_v54 }
0x1f48   :  { %v1247_v36 = vpop.permute.xlu0 %1246 }
0x1f49   :  { %v1249_v57 = vmul.f32 %v1247_v36, %v1241_v38  ;;  %v633_v36 = vmul.f32 1.442695, %v632_v33 }
0x1f4b   :  { %1251 = vrot.lane.b32.xlu2 %v1249_v57, %s1735_s3 }
0x1fa5   :  { %v1252_v62 = vpop.permute.xlu2 %1251 }
0x1fa6   :  { %v1254_v3 = vadd.f32 %v1252_v62, %v1244_v42 }
0x1fa8   :  { %1496 = vtanh.f32 %v1254_v3  ;;  %v1067_v3 = vsub.f32 %v2097_v60, %v2101_v40 }
0x1fa9   :  { %1498 = vpow2.f32 %v343_v5 }
0x1faa   :  { %1500 = vpow2.f32 %v778_v16  ;;  %v1068_v14 = vmul.f32 1.442695, %v1067_v3 }
0x1fab   :  { %1502 = vpow2.f32 %v1213_v23 }
0x1fac   :  { %1504 = vpow2.f32 %v488_v18 }
0x1fad   :  { %1506 = vpow2.f32 %v923_v29 }
0x1fae   :  { %v1497_v6 = vpop.eup %1496 }
0x1faf   :  { %1257 = vrot.lane.b32.xlu1 %v1497_v6, %s1734_s25  ;;  %v1499_v46 = vpop.eup %1498 }
0x1fb0   :  { %v345_v20 = vsel %vm290_vm5, %v1499_v46, 0.0  ;;  %v1501_v24 = vpop.eup %1500 }
0x1fb1   :  { %v780_v8 = vsel %vm290_vm5, %v1501_v24, 0.0  ;;  %v1503_v13 = vpop.eup %1502 }
0x1fb2   :  { %v1215_v26 = vsel %vm290_vm5, %v1503_v13, 0.0  ;;  %v1505_v12 = vpop.eup %1504 }
0x1fb3   :  { %v490_v56 = vsel %vm290_vm5, %v1505_v12, 0.0  ;;  %v1507_v58 = vpop.eup %1506 }
0x1fb4   :  { %v925_v59 = vsel %vm290_vm5, %v1507_v58, 0.0 }
0x1fd9   :  { %346 = vadd.xlane.f32.xlu1 %v345_v20 }
0x1fe1   :  { %781 = vadd.xlane.f32.xlu1 %v780_v8 }
0x1fe9   :  { %1216 = vadd.xlane.f32.xlu1 %v1215_v26 }
0x2021   :  { %v1258_v28 = vpop.permute.xlu1 %1257 }
0x2022   :  { %v1260_v32 = vmul.f32 %v1258_v28, %v1241_v38 }
0x2024   :  { %1262 = vrot.lane.b32.xlu0 %v1260_v32, %s1735_s3 }
0x204c   :  { %v347_v35 = vpop.xlane.xlu1 %346 }
0x204d   :  { %1508 = vlog2.f32 %v347_v35 }
0x2053   :  { %v1509_v9 = vpop.eup %1508 }
0x2054   :  { %v349_v16 = vmul.f32 0.6931472, %v1509_v9  ;;  %v782_v49 = vpop.xlane.xlu1 %781 }
0x2056   :  { %v350_v23 = vadd.f32 %v349_v16, %v1880_v52 }
0x2058   :  { %v351_v26 = vsub.f32 %v350_v23, %v1874_v48 }
0x205a   :  { %v352_v17 = vmul.f32 %v351_v26, %v1946_v7 }
0x2096   :  { %v1263_v19 = vpop.permute.xlu0 %1262 }
0x2097   :  { %1412 = vmatmul.msk.f32.vlgmr.msrb.gmra.mxu3 %vm135_vm0, %v1263_v19 }
0x211a   :  { %v1283_v34 = vpop.f32.mrf.mxu3 }
0x211b   :  { %v2175_v47 = vadd.f32 %v1531_v44, %v1283_v34 }
0x211d   :  { %v1287_v50 = vsel %vm290_vm5, %v2175_v47, -inf }
0x211e   :  { %1288 = vmax.xlane.f32.xlu0 %v1287_v50 }
0x2126   :  { %491 = vadd.xlane.f32.xlu0 %v490_v56 }
0x212e   :  { %926 = vadd.xlane.f32.xlu0 %v925_v59 }
0x2191   :  { %v2185_v37 = vpop.xlane.xlu0 %1288 }
0x2192   :  { %vm1290_vm0 = vcmp.eq.f32.partialorder %v2175_v47, %v2185_v37  ;;  %v1313_v1 = vsub.f32 %v2175_v47, %v2185_v37 }
0x2193   :  { %v1291_v38 = vsel %vm1290_vm0, %v1878_v51, 16 }
0x2194   :  { %v1314_v57 = vmul.f32 1.442695, %v1313_v1  ;;  %v1292_v42 = vsel %vm290_vm5, %v1291_v38, 2147483647 }
0x2195   :  { %v1294_v62 = vshra.s32 %v1292_v42, 16  ;;  %v1293_v52 = vand.u32 65535, %v1292_v42 }
0x2196   :  { %1510 = vpow2.f32 %v1314_v57 }
0x2197   :  { %1512 = vpow2.f32 %v633_v36  ;;  %v1296_v6 = vcvt.s32.f32 %v1294_v62  ;;  %v1295_v29 = vcvt.s32.f32 %v1293_v52 }
0x2199   :  { %1297 = vmin.xlane.f32.xlu2 %v1296_v6  ;;  %v492_v5 = vpop.xlane.xlu0 %491 }
0x219a   :  { %1514 = vlog2.f32 %v492_v5 }
0x219b   :  { %1516 = vpow2.f32 %v1068_v14 }
0x219c   :  { %v1511_v46 = vpop.eup %1510  ;;  %1518 = vlog2.f32 %v782_v49 }
0x219d   :  { %v1513_v54 = vpop.eup %1512  ;;  %v1316_v20 = vsel %vm290_vm5, %v1511_v46, 0.0 }
0x219e   :  { %1317 = vadd.xlane.f32.xlu0 %v1316_v20  ;;  %v635_v8 = vsel %vm290_vm5, %v1513_v54, 0.0 }
0x21a0   :  { %v1515_v24 = vpop.eup %1514 }
0x21a1   :  { %v494_v13 = vmul.f32 0.6931472, %v1515_v24  ;;  %636 = vadd.xlane.f32.xlu2 %v635_v8  ;;  %v1517_v32 = vpop.eup %1516  ;;  %v927_v12 = vpop.xlane.xlu0 %926 }
0x21a2   :  { %v1070_v34 = vsel %vm290_vm5, %v1517_v32, 0.0  ;;  %1520 = vlog2.f32 %v927_v12  ;;  %v1519_v56 = vpop.eup %1518 }
0x21a3   :  { %v495_v28 = vadd.f32 %v494_v13, %v1936_v45  ;;  %v1217_v45 = vpop.xlane.xlu1 %1216 }
0x21a5   :  { %v496_v19 = vsub.f32 %v495_v28, %v1932_v43 }
0x21a7   :  { %v497_v18 = vmul.f32 %v496_v19, %v1953_v10  ;;  %v784_v10 = vmul.f32 0.6931472, %v1519_v56 }
0x21a8   :  { %v1521_v7 = vpop.eup %1520 }
0x21a9   :  { %v498_v44 = vadd.f32 %v497_v18, %v352_v17  ;;  %1071 = vadd.xlane.f32.xlu2 %v1070_v34  ;;  %v929_v58 = vmul.f32 0.6931472, %v1521_v7  ;;  %v785_v33 = vadd.f32 %v784_v10, %v2024_v0 }
0x21ab   :  { %v930_v38 = vadd.f32 %v929_v58, %v2067_v41  ;;  %v786_v42 = vsub.f32 %v785_v33, %v2020_v61 }
0x21ad   :  { %v787_v0 = vmul.f32 %v786_v42, %v2040_v21 }
0x220c   :  { %v1298_v50 = vpop.xlane.xlu2 %1297 }
0x220d   :  { %vm1299_vm1 = vcmp.eq.f32.partialorder %v1296_v6, %v1298_v50  ;;  %v931_v6 = vsub.f32 %v930_v38, %v2063_v39 }
0x220e   :  { %v1300_v48 = vsel %vm1299_vm1, %v1295_v29, inf }
0x220f   :  { %1301 = vmin.xlane.f32.xlu2 %v1300_v48  ;;  %v932_v41 = vmul.f32 %v931_v6, %v2083_v22 }
0x2211   :  { %v1318_v24 = vpop.xlane.xlu0 %1317 }
0x2214   :  { %v637_v43 = vpop.xlane.xlu2 %636 }
0x2215   :  { %1522 = vlog2.f32 %v637_v43 }
0x2216   :  { %1524 = vlog2.f32 %v1217_v45 }
0x221b   :  { %v1523_v59 = vpop.eup %1522 }
0x221c   :  { %v639_v35 = vmul.f32 0.6931472, %v1523_v59  ;;  %v1072_v1 = vpop.xlane.xlu2 %1071  ;;  %v1525_v36 = vpop.eup %1524 }
0x221d   :  { %1526 = vlog2.f32 %v1072_v1  ;;  %v1219_v62 = vmul.f32 0.6931472, %v1525_v36 }
0x221e   :  { %v640_v57 = vadd.f32 %v639_v35, %v1980_v55  ;;  %1528 = vlog2.f32 %v1318_v24 }
0x221f   :  { %v1220_v14 = vadd.f32 %v1219_v62, %v2134_v2  ;;  %v1304_v2 = vcvt.f32.s32 %v1298_v50 }
0x2220   :  { %v641_v3 = vsub.f32 %v640_v57, %v1976_v53 }
0x2221   :  { %v1221_v61 = vsub.f32 %v1220_v14, %v2130_v63  ;;  %v1305_v22 = vshll.u32 %v1304_v2, 16 }
0x2222   :  { %v642_v9 = vmul.f32 %v641_v3, %v1997_v15 }
0x2223   :  { %v1527_v5 = vpop.eup %1526  ;;  %v1222_v23 = vmul.f32 %v1221_v61, %v2150_v31 }
0x2224   :  { %v643_v16 = vadd.f32 %v642_v9, %v498_v44  ;;  %v1074_v46 = vmul.f32 0.6931472, %v1527_v5  ;;  %v1529_v8 = vpop.eup %1528 }
0x2225   :  { %v1320_v26 = vmul.f32 0.6931472, %v1529_v8 }
0x2226   :  { %v1075_v55 = vadd.f32 %v1074_v46, %v2101_v40  ;;  %v788_v54 = vadd.f32 %v787_v0, %v643_v16 }
0x2227   :  { %v1321_v63 = vadd.f32 %v1320_v26, %v2185_v37 }
0x2228   :  { %v1076_v53 = vsub.f32 %v1075_v55, %v2097_v60  ;;  %v933_v20 = vadd.f32 %v932_v41, %v788_v54 }
0x2229   :  { %v1322_v19 = vsub.f32 %v1321_v63, %v2175_v47 }
0x222a   :  { %v1077_v39 = vmul.f32 %v1076_v53, %v2116_v25 }
0x222c   :  { %v1078_v15 = vadd.f32 %v1077_v39, %v933_v20 }
0x222e   :  { %v1223_v21 = vadd.f32 %v1222_v23, %v1078_v15 }
0x2282   :  { %v1302_v13 = vpop.xlane.xlu2 %1301 }
0x2283   :  { %v1303_v40 = vcvt.f32.s32 %v1302_v13 }
0x2285   :  { %v1306_v28 = vadd.s32 %v1305_v22, %v1303_v40 }
0x2287   :  { %vm1307_vm2 = vcmp.eq.s32.totalorder %v1878_v51, %v1306_v28 }
0x2288   :  { %v1413_v60 = vsel %vm1307_vm2, 1.0, %v1736_v4 }
0x2289   :  { %v1310_v25 = vmax.f32 %v1209_v30, %v1413_v60  ;;  %v1311_v32 = vsub.f32 1.0, %v1413_v60 }
0x228b   :  { %1325 = vst.msk [vmem:[#allocation14] sm:$0xf] %vm290_vm5, %v1310_v25  ;;  %v1312_v17 = vmul.f32 %v1311_v32, %v2150_v31 }
0x228c   :  { %1349 = dma.vmem_to_hbm [thread:$0]  %s1345_s30, 64, %s1347_s12, [#allocation4]  }
0x228d   :  { %v1323_v18 = vmul.f32 %v1322_v19, %v1312_v17 }
0x228f   :  { %v1324_v34 = vadd.f32 %v1323_v18, %v1223_v21 }
0x2291   :  { %v1326_v44 = vsel %vm290_vm5, %v1324_v34, 0.0 }
0x2292   :  { %1327 = vadd.xlane.f32.xlu1 %v1326_v44 }
0x2305   :  { %v1328_v51 = vpop.xlane.xlu1 %1327 }
0x2306   :  { %v1329_v4 = vrot.slane %v1328_v51, 4 }
0x2308   :  { %v1330_v11 = vadd.f32 %v1329_v4, %v1328_v51 }
0x230a   :  { %v1331_v27 = vrot.slane %v1330_v11, 2 }
0x230c   :  { %v1332_v30 = vadd.f32 %v1331_v27, %v1330_v11 }
0x230e   :  { %v1333_v31 = vrot.slane %v1332_v30, 1 }
0x2310   :  { %v1334_v47 = vadd.f32 %v1333_v31, %v1332_v30 }
0x2312   :  { %1414 = vpush %v1334_v47 }
0x2343   :  { %s1415_s15 = spop %1414 }
0x2344   :  { %s1336_s16 = smul.f32 0.001953125, %s1415_s15 }
0x2346   :  { %1338 = sst [smem:[#allocation15]] %s1336_s16 }
0x2347   :  { %1358 = dma.smem_to_hbm %s1738_s9, 16, %s1356_s0, [#allocation5]  }
0x2348   :  { %1720 = dma.done.wait [#allocation4], 64  }
0x2349   :  { %1721 = vsyncadd [#allocation4], 4294967232 }
0x234a   :  { %1722 = dma.done.wait [#allocation5], 16  }
0x234b   :  { %1723 = vsyncadd [#allocation5], 4294967280 }
0x234c   :  { %1367 = sfence }
0x234d   :  { %1368 = vsyncpa [#allocation3], 1 }
0x234e   :  { %1369 = vsyncpa [#allocation7], 1 }
0x234f   :  { %1370 = vsyncpa [#allocation10], 1 }
0x2350   :  { %1371 = vsyncpa [#allocation13], 1 }
0x2351   :  { %1372 = vsyncpa [#allocation4], 1 }
0x2352   :  { %1373 = vsyncpa [#allocation5], 1 }

</bundles_post_ra>
